<compile_context>
chip_gen: v5e
topology: v5e:2x2
jax: 0.10.0
libtpu: 0.0.40
codegen_flags: <defaults>
</compile_context>

<pallas_src>
import functools
import numpy as np
import jax
import jax.numpy as jnp
from jax import lax
from jax.experimental import pallas as pl
from jax.experimental.pallas import tpu as pltpu

# ---------------- model config (small, consistent with the module) ----------------
BATCH = 2
SEQ = 8
HIDDEN = 32
NUM_HEADS = 4
HEAD_DIM = HIDDEN // NUM_HEADS
INTER = HIDDEN * 4
SCALE = 1.0 / float(np.sqrt(HEAD_DIM))
LN_EPS = 1e-12

# Rows of the packed (8, 128) bias / LayerNorm slab.
_ROW_BO, _ROW_BI, _ROW_B2, _ROW_G1, _ROW_BE1, _ROW_G2, _ROW_BE2 = range(7)
VEC_WIDTH = 128


# ---------------- in-kernel math helpers ----------------
def _erf(x):
    # Abramowitz–Stegun 7.1.26 polynomial erf (max abs error ~1.5e-7).
    # Exact reciprocal: the approx EUP path was the source of the tolerance miss.
    a1, a2, a3, a4, a5 = 0.254829592, -0.284496736, 1.421413741, -1.453152027, 1.061405429
    p = 0.3275911
    sgn = jnp.where(x >= 0.0, 1.0, -1.0)
    ax = jnp.abs(x)
    t = pl.reciprocal(1.0 + p * ax, approx=False)
    poly = ((((a5 * t + a4) * t + a3) * t + a2) * t + a1) * t
    return sgn * (1.0 - poly * jnp.exp(-ax * ax))


def _gelu_exact(x):
    # F.gelu default (erf-based, non-approximate)
    return 0.5 * x * (1.0 + _erf(x * 0.7071067811865476))


def _layer_norm(x, gamma, beta):
    mu = jnp.mean(x, axis=-1, keepdims=True)
    var = jnp.mean((x - mu) ** 2, axis=-1, keepdims=True)
    return (x - mu) * lax.rsqrt(var + LN_EPS) * gamma + beta


# ---------------- Pallas kernel: `bb` batch elements per grid step ----------------
def bert_layer_kernel(x_ref, neg_ref, wqkv_ref, bqkv_ref, wo_ref, wi_ref, w2_ref,
                      vec_ref, out_ref):
    bb, S, H = x_ref.shape            # block: (batch_block, seq, hidden)
    inter = wi_ref.shape[1]
    nh = NUM_HEADS
    hd = H // nh

    # ---- unpack the (8, 128) bias / LayerNorm slab (static sublane slices) ----
    vec = vec_ref[...]
    bo = vec[_ROW_BO:_ROW_BO + 1, 0:H]
    bi = vec[_ROW_BI:_ROW_BI + 1, 0:inter]
    b2 = vec[_ROW_B2:_ROW_B2 + 1, 0:H]
    g1 = vec[_ROW_G1:_ROW_G1 + 1, 0:H]
    be1 = vec[_ROW_BE1:_ROW_BE1 + 1, 0:H]
    g2 = vec[_ROW_G2:_ROW_G2 + 1, 0:H]
    be2 = vec[_ROW_BE2:_ROW_BE2 + 1, 0:H]
    wo = wo_ref[...]                                  # (H, H); rows grouped per head

    # Collapse batch into sublanes so every dense matmul / LayerNorm / FFN op runs
    # once over the whole block.
    x = x_ref[...].reshape(bb * S, H).astype(jnp.float32)            # (bb*S, H)

    # ---- fused QKV projection, computed TRANSPOSED: (3H, bb*S) ----
    # Per-head q/k/v become 8-row sublane slices (tile aligned) instead of
    # lane-extract relayouts.  Wq / bq carry the 1/sqrt(head_dim) scale.
    qkv_t = lax.dot_general(
        wqkv_ref[...], x, dimension_numbers=(((1,), (1,)), ((), ())),
        preferred_element_type=jnp.float32) + bqkv_ref[...]          # (3H, bb*S)

    # Additive key-padding bias (0 keep / -1e30 pad), precomputed in the wrapper.
    neg = neg_ref[...]                                               # (bb, 1, S)

    # ---- attention scores for every (batch, head) pair ----
    score_blocks = []
    v_t_blocks = []
    for b in range(bb):                               # static, unrolled (bb tiny)
        qkv_tb = qkv_t[:, b * S:(b + 1) * S]          # (3H, S): one lane slice per b
        neg_b = neg[b]                                # (1, S)
        for h in range(nh):                           # static, unrolled
            q_t = qkv_tb[h * hd:(h + 1) * hd, :]                      # (hd, S)
            k_t = qkv_tb[H + h * hd:H + (h + 1) * hd, :]              # (hd, S)
            v_t = qkv_tb[2 * H + h * hd:2 * H + (h + 1) * hd, :]      # (hd, S)
            s = lax.dot_general(                                      # (S, S) = q @ k^T
                q_t, k_t, dimension_numbers=(((0,), (0,)), ((), ())),
                preferred_element_type=jnp.float32) + neg_b
            score_blocks.append(s)
            v_t_blocks.append(v_t)

    # ---- ONE batched softmax over all bb*nh heads (stacked along sublanes) ----
    scores = jnp.concatenate(score_blocks, axis=0)                    # (bb*nh*S, S)
    m = jnp.max(scores, axis=-1, keepdims=True)
    e = jnp.exp(scores - m)
    denom = jnp.sum(e, axis=-1, keepdims=True)
    p = e * pl.reciprocal(denom, approx=False)        # exact: one recip per grid step

    # ---- p @ V, head-concat folded into the output projection (accumulate) ----
    attn_blocks = []
    for b in range(bb):
        attn_b = jnp.zeros((S, H), jnp.float32)
        for h in range(nh):
            idx = b * nh + h
            p_bh = p[idx * S:(idx + 1) * S, :]                        # sublane slice
            ctx = lax.dot_general(                                    # (S, hd) = p @ v
                p_bh, v_t_blocks[idx],
                dimension_numbers=(((1,), (1,)), ((), ())),
                preferred_element_type=jnp.float32)
            attn_b = attn_b + jnp.dot(ctx, wo[h * hd:(h + 1) * hd, :],
                                      preferred_element_type=jnp.float32)
        attn_blocks.append(attn_b)
    attn = attn_blocks[0] if bb == 1 else jnp.concatenate(attn_blocks, axis=0)
    attn = attn + bo                                                  # (bb*S, H)

    # ---- residual + LayerNorm (attention) ----
    y1 = _layer_norm(x + attn, g1, be1)

    # ---- feed-forward: Linear -> exact GELU -> Linear ----
    ffn_in = jnp.dot(y1, wi_ref[...], preferred_element_type=jnp.float32) + bi
    ffn = jnp.dot(_gelu_exact(ffn_in), w2_ref[...],
                  preferred_element_type=jnp.float32) + b2

    # ---- residual + LayerNorm (output) ----
    y2 = _layer_norm(y1 + ffn, g2, be2)
    # TODO(synk): output is (.., H=32) -> lane-masked store; only worth a lane-dense
    # (B, S*H//128, 128) relayout if xprof shows the final store on the critical path.
    out_ref[...] = y2.reshape(out_ref.shape).astype(out_ref.dtype)


# ---------------- wrapper ----------------
def _const_spec(shape):
    n = len(shape)
    return pl.BlockSpec(shape, lambda i, _n=n: (0,) * _n)


@functools.partial(jax.jit, static_argnames=("batch_block",))
def bert_layer(x, attention_mask, wqkv_t, bqkv_t, wo, wi, w2, vec, *,
               batch_block=BATCH):
    """x: (B, S, H) f32; attention_mask: (B, S) with 1 = keep, 0 = pad."""
    B, S, H = x.shape
    bb = batch_block
    assert B % bb == 0, "batch_block must divide batch"
    # Additive key-padding bias computed once here (fuses into the XLA graph).
    neg = ((attention_mask.astype(jnp.float32) - 1.0) * 1e30).reshape(B, 1, S)

    grid = (B // bb,)
    in_specs = [
        pl.BlockSpec((bb, S, H), lambda i: (i, 0, 0)),     # hidden states
        pl.BlockSpec((bb, 1, S), lambda i: (i, 0, 0)),     # additive mask bias
        _const_spec(wqkv_t.shape),                         # fused QKV weight (3H, H)
        _const_spec(bqkv_t.shape),                         # fused QKV bias   (3H, 1)
        _const_spec(wo.shape),                             # out-proj weight  (H, H)
        _const_spec(wi.shape),                             # intermediate W   (H, 4H)
        _const_spec(w2.shape),                             # output W         (4H, H)
        _const_spec(vec.shape),                            # packed biases / LN params
    ]
    sem = ("arbitrary",) if grid[0] == 1 else ("parallel",)
    return pl.pallas_call(
        bert_layer_kernel,
        out_shape=jax.ShapeDtypeStruct((B, S, H), jnp.float32),
        grid=grid,
        in_specs=in_specs,
        out_specs=pl.BlockSpec((bb, S, H), lambda i: (i, 0, 0)),
        compiler_params=pltpu.CompilerParams(dimension_semantics=sem),
    )(x, neg, wqkv_t, bqkv_t, wo, wi, w2, vec)


# ---------------- parameter packing (one-time, outside the kernel) ----------------
def pack_params(params):
    """Pack the 16 PyTorch-style tensors into the 6 kernel operands."""
    (wq, wk, wv, bq, bk, bv, wo, bo, wi, bi, w2, b2, g1, be1, g2, be2) = params
    assert HIDDEN <= VEC_WIDTH and INTER <= VEC_WIDTH, "vec slab would truncate biases"
    # Transposed fused QKV weight: qkv^T = Wqkv_T @ x^T; q rows pre-scaled by 1/sqrt(hd).
    wqkv_t = jnp.concatenate([wq.T * SCALE, wk.T, wv.T], axis=0)       # (3H, H)
    bqkv_t = jnp.concatenate([bq * SCALE, bk, bv], axis=1).reshape(3 * HIDDEN, 1)
    vec = jnp.zeros((8, VEC_WIDTH), jnp.float32)
    vec = vec.at[_ROW_BO, 0:HIDDEN].set(bo[0])
    vec = vec.at[_ROW_BI, 0:INTER].set(bi[0])
    vec = vec.at[_ROW_B2, 0:HIDDEN].set(b2[0])
    vec = vec.at[_ROW_G1, 0:HIDDEN].set(g1[0])
    vec = vec.at[_ROW_BE1, 0:HIDDEN].set(be1[0])
    vec = vec.at[_ROW_G2, 0:HIDDEN].set(g2[0])
    vec = vec.at[_ROW_BE2, 0:HIDDEN].set(be2[0])
    return wqkv_t, bqkv_t, wo, wi, w2, vec


# ---------------- plain-JAX reference (for correctness check) ----------------
def bert_layer_ref(x, attention_mask, params):
    (wq, wk, wv, bq, bk, bv, wo, bo, wi, bi, w2, b2, g1, be1, g2, be2) = params
    B, S, H = x.shape

    def ln(z, g, b):
        mu = jnp.mean(z, -1, keepdims=True)
        var = jnp.mean((z - mu) ** 2, -1, keepdims=True)
        return (z - mu) / jnp.sqrt(var + LN_EPS) * g + b

    q = (x @ wq + bq) * SCALE
    k = x @ wk + bk
    v = x @ wv + bv
    q = q.reshape(B, S, NUM_HEADS, HEAD_DIM).transpose(0, 2, 1, 3)
    k = k.reshape(B, S, NUM_HEADS, HEAD_DIM).transpose(0, 2, 1, 3)
    v = v.reshape(B, S, NUM_HEADS, HEAD_DIM).transpose(0, 2, 1, 3)
    s = jnp.einsum("bhqd,bhkd->bhqk", q, k)
    neg = jnp.where(attention_mask[:, None, None, :] == 0, -1e30, 0.0)
    p = jax.nn.softmax(s + neg, axis=-1)
    ctx = jnp.einsum("bhqk,bhkd->bhqd", p, v).transpose(0, 2, 1, 3).reshape(B, S, H)
    attn = ctx @ wo + bo
    y1 = ln(x + attn, g1, be1)
    inter = jax.nn.gelu(y1 @ wi + bi, approximate=False)
    out = inter @ w2 + b2
    return ln(y1 + out, g2, be2)


# ---------------- deterministic parameter construction ----------------
def make_params(key):
    ks = jax.random.split(key, 12)
    std = 0.05
    # nn.MultiheadAttention: in_proj_weight (3H, H), in_proj_bias (3H,)
    in_proj_w = jax.random.normal(ks[0], (3 * HIDDEN, HIDDEN), jnp.float32) * std
    in_proj_b = jax.random.normal(ks[1], (3 * HIDDEN,), jnp.float32) * std
    wq = in_proj_w[0:HIDDEN].T                  # pre-transposed: reference does x @ W
    wk = in_proj_w[HIDDEN:2 * HIDDEN].T
    wv = in_proj_w[2 * HIDDEN:].T
    bq = in_proj_b[0:HIDDEN].reshape(1, HIDDEN)
    bk = in_proj_b[HIDDEN:2 * HIDDEN].reshape(1, HIDDEN)
    bv = in_proj_b[2 * HIDDEN:].reshape(1, HIDDEN)
    # out_proj
    wo = (jax.random.normal(ks[2], (HIDDEN, HIDDEN), jnp.float32) * std).T
    bo = (jax.random.normal(ks[3], (HIDDEN,), jnp.float32) * std).reshape(1, HIDDEN)
    # intermediate Linear(H, 4H)
    wi = (jax.random.normal(ks[4], (INTER, HIDDEN), jnp.float32) * std).T
    bi = (jax.random.normal(ks[5], (INTER,), jnp.float32) * std).reshape(1, INTER)
    # output Linear(4H, H)
    w2 = (jax.random.normal(ks[6], (HIDDEN, INTER), jnp.float32) * std).T
    b2 = (jax.random.normal(ks[7], (HIDDEN,), jnp.float32) * std).reshape(1, HIDDEN)
    # LayerNorms
    g1 = (1.0 + jax.random.normal(ks[8], (HIDDEN,), jnp.float32) * 0.01).reshape(1, HIDDEN)
    be1 = (jax.random.normal(ks[9], (HIDDEN,), jnp.float32) * 0.01).reshape(1, HIDDEN)
    g2 = (1.0 + jax.random.normal(ks[10], (HIDDEN,), jnp.float32) * 0.01).reshape(1, HIDDEN)
    be2 = (jax.random.normal(ks[11], (HIDDEN,), jnp.float32) * 0.01).reshape(1, HIDDEN)
    return (wq, wk, wv, bq, bk, bv, wo, bo, wi, bi, w2, b2, g1, be1, g2, be2)


if __name__ == "__main__":
    key = jax.random.PRNGKey(0)
    kx, kp = jax.random.split(key)
    x = jax.random.normal(kx, (BATCH, SEQ, HIDDEN), jnp.float32)
    attention_mask = jnp.ones((BATCH, SEQ), jnp.int32)   # no padding
    params = make_params(kp)
    operands = pack_params(params)

    # Whole batch fused into one grid step (launch/latency-bound kernel).
    out = bert_layer(x, attention_mask, *operands, batch_block=BATCH)
    out = jax.block_until_ready(out)

    ref = bert_layer_ref(x, attention_mask, params)
    assert out.shape == (BATCH, SEQ, HIDDEN)
    err = float(jnp.max(jnp.abs(out - ref)))
    assert err < 1e-4, err

    print("KERNEL_OK")
</pallas_src>

<mosaic_0001>
module attributes {stable_mosaic.version = 11 : i64} {
  func.func @bert_layer_kernel(%arg0: i32, %arg1: memref<2x8x32xf32, #tpu.memory_space<vmem>>, %arg2: memref<2x1x8xf32, #tpu.memory_space<vmem>>, %arg3: memref<96x32xf32, #tpu.memory_space<vmem>>, %arg4: memref<96x1xf32, #tpu.memory_space<vmem>>, %arg5: memref<32x32xf32, #tpu.memory_space<vmem>>, %arg6: memref<32x128xf32, #tpu.memory_space<vmem>>, %arg7: memref<128x32xf32, #tpu.memory_space<vmem>>, %arg8: memref<8x128xf32, #tpu.memory_space<vmem>>, %arg9: memref<2x8x32xf32, #tpu.memory_space<vmem>>) attributes {dimension_semantics = [#tpu.dimension_semantics<arbitrary>], iteration_bounds = array<i64: 1>, scalar_prefetch = 0 : i64, scratch_operands = 0 : i64, tpu.core_type = #tpu.core_type<tc>, window_params = [{transform_indices = @transform_0, window_bounds = array<i64: 2, 8, 32>}, {transform_indices = @transform_1, window_bounds = array<i64: 2, 1, 8>}, {pipeline_mode = #tpu.pipeline_mode<synchronous>, transform_indices = @transform_2, window_bounds = array<i64: 96, 32>}, {pipeline_mode = #tpu.pipeline_mode<synchronous>, transform_indices = @transform_3, window_bounds = array<i64: 96, 1>}, {pipeline_mode = #tpu.pipeline_mode<synchronous>, transform_indices = @transform_4, window_bounds = array<i64: 32, 32>}, {pipeline_mode = #tpu.pipeline_mode<synchronous>, transform_indices = @transform_5, window_bounds = array<i64: 32, 128>}, {pipeline_mode = #tpu.pipeline_mode<synchronous>, transform_indices = @transform_6, window_bounds = array<i64: 128, 32>}, {pipeline_mode = #tpu.pipeline_mode<synchronous>, transform_indices = @transform_7, window_bounds = array<i64: 8, 128>}, {transform_indices = @transform_8, window_bounds = array<i64: 2, 8, 32>}]} {
    %c0 = arith.constant 0 : index
    %c0_0 = arith.constant 0 : index
    %0 = vector.load %arg8[%c0, %c0_0] : memref<8x128xf32, #tpu.memory_space<vmem>>, vector<8x128xf32>
    %1 = vector.extract_strided_slice %0 {offsets = [0, 0], sizes = [1, 32], strides = [1, 1]} : vector<8x128xf32> to vector<1x32xf32>
    %2 = vector.extract_strided_slice %0 {offsets = [1, 0], sizes = [1, 128], strides = [1, 1]} : vector<8x128xf32> to vector<1x128xf32>
    %3 = vector.extract_strided_slice %0 {offsets = [2, 0], sizes = [1, 32], strides = [1, 1]} : vector<8x128xf32> to vector<1x32xf32>
    %4 = vector.extract_strided_slice %0 {offsets = [3, 0], sizes = [1, 32], strides = [1, 1]} : vector<8x128xf32> to vector<1x32xf32>
    %5 = vector.extract_strided_slice %0 {offsets = [4, 0], sizes = [1, 32], strides = [1, 1]} : vector<8x128xf32> to vector<1x32xf32>
    %6 = vector.extract_strided_slice %0 {offsets = [5, 0], sizes = [1, 32], strides = [1, 1]} : vector<8x128xf32> to vector<1x32xf32>
    %7 = vector.extract_strided_slice %0 {offsets = [6, 0], sizes = [1, 32], strides = [1, 1]} : vector<8x128xf32> to vector<1x32xf32>
    %c0_1 = arith.constant 0 : index
    %c0_2 = arith.constant 0 : index
    %8 = vector.load %arg5[%c0_1, %c0_2] : memref<32x32xf32, #tpu.memory_space<vmem>>, vector<32x32xf32>
    %c0_3 = arith.constant 0 : index
    %c0_4 = arith.constant 0 : index
    %c0_5 = arith.constant 0 : index
    %9 = vector.load %arg1[%c0_3, %c0_4, %c0_5] : memref<2x8x32xf32, #tpu.memory_space<vmem>>, vector<2x8x32xf32>
    %10 = vector.shape_cast %9 : vector<2x8x32xf32> to vector<16x32xf32>
    %c0_6 = arith.constant 0 : index
    %c0_7 = arith.constant 0 : index
    %11 = vector.load %arg3[%c0_6, %c0_7] : memref<96x32xf32, #tpu.memory_space<vmem>>, vector<96x32xf32>
    %cst = arith.constant dense<0.000000e+00> : vector<96x16xf32>
    %12 = tpu.matmul %11, %10, %cst {dimension_numbers = #tpu.dot_dimension_numbers<[1], [1], [0], [0], [0, 0, 1, 0], [], []>} : vector<96x32xf32>, vector<16x32xf32>, vector<96x16xf32> -> vector<96x16xf32>
    %c0_8 = arith.constant 0 : index
    %c0_9 = arith.constant 0 : index
    %13 = vector.load %arg4[%c0_8, %c0_9] : memref<96x1xf32, #tpu.memory_space<vmem>>, vector<96x1xf32>
    %14 = vector.broadcast %13 : vector<96x1xf32> to vector<96x16xf32>
    %15 = arith.addf %12, %14 : vector<96x16xf32>
    %c0_10 = arith.constant 0 : index
    %c0_11 = arith.constant 0 : index
    %c0_12 = arith.constant 0 : index
    %16 = vector.load %arg2[%c0_10, %c0_11, %c0_12] : memref<2x1x8xf32, #tpu.memory_space<vmem>>, vector<2x1x8xf32>
    %17 = vector.extract_strided_slice %15 {offsets = [0, 0], sizes = [96, 8], strides = [1, 1]} : vector<96x16xf32> to vector<96x8xf32>
    %18 = vector.extract_strided_slice %16 {offsets = [0, 0, 0], sizes = [1, 1, 8], strides = [1, 1, 1]} : vector<2x1x8xf32> to vector<1x1x8xf32>
    %19 = vector.shape_cast %18 : vector<1x1x8xf32> to vector<1x8xf32>
    %20 = vector.extract_strided_slice %17 {offsets = [0, 0], sizes = [8, 8], strides = [1, 1]} : vector<96x8xf32> to vector<8x8xf32>
    %21 = vector.extract_strided_slice %17 {offsets = [32, 0], sizes = [8, 8], strides = [1, 1]} : vector<96x8xf32> to vector<8x8xf32>
    %22 = vector.extract_strided_slice %17 {offsets = [64, 0], sizes = [8, 8], strides = [1, 1]} : vector<96x8xf32> to vector<8x8xf32>
    %cst_13 = arith.constant dense<0.000000e+00> : vector<8x8xf32>
    %23 = tpu.matmul %20, %21, %cst_13 {dimension_numbers = #tpu.dot_dimension_numbers<[0], [0], [1], [1], [0, 1, 1, 1], [], []>} : vector<8x8xf32>, vector<8x8xf32>, vector<8x8xf32> -> vector<8x8xf32>
    %24 = vector.broadcast %19 : vector<1x8xf32> to vector<8x8xf32>
    %25 = arith.addf %23, %24 : vector<8x8xf32>
    %26 = vector.extract_strided_slice %17 {offsets = [8, 0], sizes = [8, 8], strides = [1, 1]} : vector<96x8xf32> to vector<8x8xf32>
    %27 = vector.extract_strided_slice %17 {offsets = [40, 0], sizes = [8, 8], strides = [1, 1]} : vector<96x8xf32> to vector<8x8xf32>
    %28 = vector.extract_strided_slice %17 {offsets = [72, 0], sizes = [8, 8], strides = [1, 1]} : vector<96x8xf32> to vector<8x8xf32>
    %cst_14 = arith.constant dense<0.000000e+00> : vector<8x8xf32>
    %29 = tpu.matmul %26, %27, %cst_14 {dimension_numbers = #tpu.dot_dimension_numbers<[0], [0], [1], [1], [0, 1, 1, 1], [], []>} : vector<8x8xf32>, vector<8x8xf32>, vector<8x8xf32> -> vector<8x8xf32>
    %30 = vector.broadcast %19 : vector<1x8xf32> to vector<8x8xf32>
    %31 = arith.addf %29, %30 : vector<8x8xf32>
    %32 = vector.extract_strided_slice %17 {offsets = [16, 0], sizes = [8, 8], strides = [1, 1]} : vector<96x8xf32> to vector<8x8xf32>
    %33 = vector.extract_strided_slice %17 {offsets = [48, 0], sizes = [8, 8], strides = [1, 1]} : vector<96x8xf32> to vector<8x8xf32>
    %34 = vector.extract_strided_slice %17 {offsets = [80, 0], sizes = [8, 8], strides = [1, 1]} : vector<96x8xf32> to vector<8x8xf32>
    %cst_15 = arith.constant dense<0.000000e+00> : vector<8x8xf32>
    %35 = tpu.matmul %32, %33, %cst_15 {dimension_numbers = #tpu.dot_dimension_numbers<[0], [0], [1], [1], [0, 1, 1, 1], [], []>} : vector<8x8xf32>, vector<8x8xf32>, vector<8x8xf32> -> vector<8x8xf32>
    %36 = vector.broadcast %19 : vector<1x8xf32> to vector<8x8xf32>
    %37 = arith.addf %35, %36 : vector<8x8xf32>
    %38 = vector.extract_strided_slice %17 {offsets = [24, 0], sizes = [8, 8], strides = [1, 1]} : vector<96x8xf32> to vector<8x8xf32>
    %39 = vector.extract_strided_slice %17 {offsets = [56, 0], sizes = [8, 8], strides = [1, 1]} : vector<96x8xf32> to vector<8x8xf32>
    %40 = vector.extract_strided_slice %17 {offsets = [88, 0], sizes = [8, 8], strides = [1, 1]} : vector<96x8xf32> to vector<8x8xf32>
    %cst_16 = arith.constant dense<0.000000e+00> : vector<8x8xf32>
    %41 = tpu.matmul %38, %39, %cst_16 {dimension_numbers = #tpu.dot_dimension_numbers<[0], [0], [1], [1], [0, 1, 1, 1], [], []>} : vector<8x8xf32>, vector<8x8xf32>, vector<8x8xf32> -> vector<8x8xf32>
    %42 = vector.broadcast %19 : vector<1x8xf32> to vector<8x8xf32>
    %43 = arith.addf %41, %42 : vector<8x8xf32>
    %44 = vector.extract_strided_slice %15 {offsets = [0, 8], sizes = [96, 8], strides = [1, 1]} : vector<96x16xf32> to vector<96x8xf32>
    %45 = vector.extract_strided_slice %16 {offsets = [1, 0, 0], sizes = [1, 1, 8], strides = [1, 1, 1]} : vector<2x1x8xf32> to vector<1x1x8xf32>
    %46 = vector.shape_cast %45 : vector<1x1x8xf32> to vector<1x8xf32>
    %47 = vector.extract_strided_slice %44 {offsets = [0, 0], sizes = [8, 8], strides = [1, 1]} : vector<96x8xf32> to vector<8x8xf32>
    %48 = vector.extract_strided_slice %44 {offsets = [32, 0], sizes = [8, 8], strides = [1, 1]} : vector<96x8xf32> to vector<8x8xf32>
    %49 = vector.extract_strided_slice %44 {offsets = [64, 0], sizes = [8, 8], strides = [1, 1]} : vector<96x8xf32> to vector<8x8xf32>
    %cst_17 = arith.constant dense<0.000000e+00> : vector<8x8xf32>
    %50 = tpu.matmul %47, %48, %cst_17 {dimension_numbers = #tpu.dot_dimension_numbers<[0], [0], [1], [1], [0, 1, 1, 1], [], []>} : vector<8x8xf32>, vector<8x8xf32>, vector<8x8xf32> -> vector<8x8xf32>
    %51 = vector.broadcast %46 : vector<1x8xf32> to vector<8x8xf32>
    %52 = arith.addf %50, %51 : vector<8x8xf32>
    %53 = vector.extract_strided_slice %44 {offsets = [8, 0], sizes = [8, 8], strides = [1, 1]} : vector<96x8xf32> to vector<8x8xf32>
    %54 = vector.extract_strided_slice %44 {offsets = [40, 0], sizes = [8, 8], strides = [1, 1]} : vector<96x8xf32> to vector<8x8xf32>
    %55 = vector.extract_strided_slice %44 {offsets = [72, 0], sizes = [8, 8], strides = [1, 1]} : vector<96x8xf32> to vector<8x8xf32>
    %cst_18 = arith.constant dense<0.000000e+00> : vector<8x8xf32>
    %56 = tpu.matmul %53, %54, %cst_18 {dimension_numbers = #tpu.dot_dimension_numbers<[0], [0], [1], [1], [0, 1, 1, 1], [], []>} : vector<8x8xf32>, vector<8x8xf32>, vector<8x8xf32> -> vector<8x8xf32>
    %57 = vector.broadcast %46 : vector<1x8xf32> to vector<8x8xf32>
    %58 = arith.addf %56, %57 : vector<8x8xf32>
    %59 = vector.extract_strided_slice %44 {offsets = [16, 0], sizes = [8, 8], strides = [1, 1]} : vector<96x8xf32> to vector<8x8xf32>
    %60 = vector.extract_strided_slice %44 {offsets = [48, 0], sizes = [8, 8], strides = [1, 1]} : vector<96x8xf32> to vector<8x8xf32>
    %61 = vector.extract_strided_slice %44 {offsets = [80, 0], sizes = [8, 8], strides = [1, 1]} : vector<96x8xf32> to vector<8x8xf32>
    %cst_19 = arith.constant dense<0.000000e+00> : vector<8x8xf32>
    %62 = tpu.matmul %59, %60, %cst_19 {dimension_numbers = #tpu.dot_dimension_numbers<[0], [0], [1], [1], [0, 1, 1, 1], [], []>} : vector<8x8xf32>, vector<8x8xf32>, vector<8x8xf32> -> vector<8x8xf32>
    %63 = vector.broadcast %46 : vector<1x8xf32> to vector<8x8xf32>
    %64 = arith.addf %62, %63 : vector<8x8xf32>
    %65 = vector.extract_strided_slice %44 {offsets = [24, 0], sizes = [8, 8], strides = [1, 1]} : vector<96x8xf32> to vector<8x8xf32>
    %66 = vector.extract_strided_slice %44 {offsets = [56, 0], sizes = [8, 8], strides = [1, 1]} : vector<96x8xf32> to vector<8x8xf32>
    %67 = vector.extract_strided_slice %44 {offsets = [88, 0], sizes = [8, 8], strides = [1, 1]} : vector<96x8xf32> to vector<8x8xf32>
    %cst_20 = arith.constant dense<0.000000e+00> : vector<8x8xf32>
    %68 = tpu.matmul %65, %66, %cst_20 {dimension_numbers = #tpu.dot_dimension_numbers<[0], [0], [1], [1], [0, 1, 1, 1], [], []>} : vector<8x8xf32>, vector<8x8xf32>, vector<8x8xf32> -> vector<8x8xf32>
    %69 = vector.broadcast %46 : vector<1x8xf32> to vector<8x8xf32>
    %70 = arith.addf %68, %69 : vector<8x8xf32>
    %71 = tpu.concatenate %25, %31, %37, %43, %52, %58, %64, %70 in 0 : vector<8x8xf32>, vector<8x8xf32>, vector<8x8xf32>, vector<8x8xf32>, vector<8x8xf32>, vector<8x8xf32>, vector<8x8xf32>, vector<8x8xf32> -> vector<64x8xf32>
    %cst_21 = arith.constant dense<0xFF800000> : vector<64xf32>
    %72 = vector.multi_reduction <maximumf>, %71, %cst_21 [1] : vector<64x8xf32> to vector<64xf32>
    %73 = vector.shape_cast %72 : vector<64xf32> to vector<64x1xf32>
    %74 = vector.broadcast %73 : vector<64x1xf32> to vector<64x8xf32>
    %75 = arith.subf %71, %74 : vector<64x8xf32>
    %76 = math.exp %75 : vector<64x8xf32>
    %cst_22 = arith.constant dense<0.000000e+00> : vector<64xf32>
    %77 = vector.multi_reduction <add>, %76, %cst_22 [1] : vector<64x8xf32> to vector<64xf32>
    %78 = vector.shape_cast %77 : vector<64xf32> to vector<64x1xf32>
    %79 = tpu.reciprocal %78 : vector<64x1xf32> -> vector<64x1xf32>
    %80 = vector.broadcast %79 : vector<64x1xf32> to vector<64x8xf32>
    %81 = arith.mulf %76, %80 : vector<64x8xf32>
    %cst_23 = arith.constant 0.000000e+00 : f32
    %82 = vector.broadcast %cst_23 : f32 to vector<8x32xf32>
    %83 = vector.extract_strided_slice %81 {offsets = [0, 0], sizes = [8, 8], strides = [1, 1]} : vector<64x8xf32> to vector<8x8xf32>
    %cst_24 = arith.constant dense<0.000000e+00> : vector<8x8xf32>
    %84 = tpu.matmul %83, %22, %cst_24 {dimension_numbers = #tpu.dot_dimension_numbers<[1], [1], [0], [0], [0, 0, 1, 0], [], []>} : vector<8x8xf32>, vector<8x8xf32>, vector<8x8xf32> -> vector<8x8xf32>
    %85 = vector.extract_strided_slice %8 {offsets = [0, 0], sizes = [8, 32], strides = [1, 1]} : vector<32x32xf32> to vector<8x32xf32>
    %cst_25 = arith.constant dense<0.000000e+00> : vector<8x32xf32>
    %86 = tpu.matmul %84, %85, %cst_25 {dimension_numbers = #tpu.dot_dimension_numbers<[1], [0], [0], [1], [0, 0, 1, 1], [], []>} : vector<8x8xf32>, vector<8x32xf32>, vector<8x32xf32> -> vector<8x32xf32>
    %87 = arith.addf %82, %86 : vector<8x32xf32>
    %88 = vector.extract_strided_slice %81 {offsets = [8, 0], sizes = [8, 8], strides = [1, 1]} : vector<64x8xf32> to vector<8x8xf32>
    %cst_26 = arith.constant dense<0.000000e+00> : vector<8x8xf32>
    %89 = tpu.matmul %88, %28, %cst_26 {dimension_numbers = #tpu.dot_dimension_numbers<[1], [1], [0], [0], [0, 0, 1, 0], [], []>} : vector<8x8xf32>, vector<8x8xf32>, vector<8x8xf32> -> vector<8x8xf32>
    %90 = vector.extract_strided_slice %8 {offsets = [8, 0], sizes = [8, 32], strides = [1, 1]} : vector<32x32xf32> to vector<8x32xf32>
    %cst_27 = arith.constant dense<0.000000e+00> : vector<8x32xf32>
    %91 = tpu.matmul %89, %90, %cst_27 {dimension_numbers = #tpu.dot_dimension_numbers<[1], [0], [0], [1], [0, 0, 1, 1], [], []>} : vector<8x8xf32>, vector<8x32xf32>, vector<8x32xf32> -> vector<8x32xf32>
    %92 = arith.addf %87, %91 : vector<8x32xf32>
    %93 = vector.extract_strided_slice %81 {offsets = [16, 0], sizes = [8, 8], strides = [1, 1]} : vector<64x8xf32> to vector<8x8xf32>
    %cst_28 = arith.constant dense<0.000000e+00> : vector<8x8xf32>
    %94 = tpu.matmul %93, %34, %cst_28 {dimension_numbers = #tpu.dot_dimension_numbers<[1], [1], [0], [0], [0, 0, 1, 0], [], []>} : vector<8x8xf32>, vector<8x8xf32>, vector<8x8xf32> -> vector<8x8xf32>
    %95 = vector.extract_strided_slice %8 {offsets = [16, 0], sizes = [8, 32], strides = [1, 1]} : vector<32x32xf32> to vector<8x32xf32>
    %cst_29 = arith.constant dense<0.000000e+00> : vector<8x32xf32>
    %96 = tpu.matmul %94, %95, %cst_29 {dimension_numbers = #tpu.dot_dimension_numbers<[1], [0], [0], [1], [0, 0, 1, 1], [], []>} : vector<8x8xf32>, vector<8x32xf32>, vector<8x32xf32> -> vector<8x32xf32>
    %97 = arith.addf %92, %96 : vector<8x32xf32>
    %98 = vector.extract_strided_slice %81 {offsets = [24, 0], sizes = [8, 8], strides = [1, 1]} : vector<64x8xf32> to vector<8x8xf32>
    %cst_30 = arith.constant dense<0.000000e+00> : vector<8x8xf32>
    %99 = tpu.matmul %98, %40, %cst_30 {dimension_numbers = #tpu.dot_dimension_numbers<[1], [1], [0], [0], [0, 0, 1, 0], [], []>} : vector<8x8xf32>, vector<8x8xf32>, vector<8x8xf32> -> vector<8x8xf32>
    %100 = vector.extract_strided_slice %8 {offsets = [24, 0], sizes = [8, 32], strides = [1, 1]} : vector<32x32xf32> to vector<8x32xf32>
    %cst_31 = arith.constant dense<0.000000e+00> : vector<8x32xf32>
    %101 = tpu.matmul %99, %100, %cst_31 {dimension_numbers = #tpu.dot_dimension_numbers<[1], [0], [0], [1], [0, 0, 1, 1], [], []>} : vector<8x8xf32>, vector<8x32xf32>, vector<8x32xf32> -> vector<8x32xf32>
    %102 = arith.addf %97, %101 : vector<8x32xf32>
    %cst_32 = arith.constant 0.000000e+00 : f32
    %103 = vector.broadcast %cst_32 : f32 to vector<8x32xf32>
    %104 = vector.extract_strided_slice %81 {offsets = [32, 0], sizes = [8, 8], strides = [1, 1]} : vector<64x8xf32> to vector<8x8xf32>
    %cst_33 = arith.constant dense<0.000000e+00> : vector<8x8xf32>
    %105 = tpu.matmul %104, %49, %cst_33 {dimension_numbers = #tpu.dot_dimension_numbers<[1], [1], [0], [0], [0, 0, 1, 0], [], []>} : vector<8x8xf32>, vector<8x8xf32>, vector<8x8xf32> -> vector<8x8xf32>
    %106 = vector.extract_strided_slice %8 {offsets = [0, 0], sizes = [8, 32], strides = [1, 1]} : vector<32x32xf32> to vector<8x32xf32>
    %cst_34 = arith.constant dense<0.000000e+00> : vector<8x32xf32>
    %107 = tpu.matmul %105, %106, %cst_34 {dimension_numbers = #tpu.dot_dimension_numbers<[1], [0], [0], [1], [0, 0, 1, 1], [], []>} : vector<8x8xf32>, vector<8x32xf32>, vector<8x32xf32> -> vector<8x32xf32>
    %108 = arith.addf %103, %107 : vector<8x32xf32>
    %109 = vector.extract_strided_slice %81 {offsets = [40, 0], sizes = [8, 8], strides = [1, 1]} : vector<64x8xf32> to vector<8x8xf32>
    %cst_35 = arith.constant dense<0.000000e+00> : vector<8x8xf32>
    %110 = tpu.matmul %109, %55, %cst_35 {dimension_numbers = #tpu.dot_dimension_numbers<[1], [1], [0], [0], [0, 0, 1, 0], [], []>} : vector<8x8xf32>, vector<8x8xf32>, vector<8x8xf32> -> vector<8x8xf32>
    %111 = vector.extract_strided_slice %8 {offsets = [8, 0], sizes = [8, 32], strides = [1, 1]} : vector<32x32xf32> to vector<8x32xf32>
    %cst_36 = arith.constant dense<0.000000e+00> : vector<8x32xf32>
    %112 = tpu.matmul %110, %111, %cst_36 {dimension_numbers = #tpu.dot_dimension_numbers<[1], [0], [0], [1], [0, 0, 1, 1], [], []>} : vector<8x8xf32>, vector<8x32xf32>, vector<8x32xf32> -> vector<8x32xf32>
    %113 = arith.addf %108, %112 : vector<8x32xf32>
    %114 = vector.extract_strided_slice %81 {offsets = [48, 0], sizes = [8, 8], strides = [1, 1]} : vector<64x8xf32> to vector<8x8xf32>
    %cst_37 = arith.constant dense<0.000000e+00> : vector<8x8xf32>
    %115 = tpu.matmul %114, %61, %cst_37 {dimension_numbers = #tpu.dot_dimension_numbers<[1], [1], [0], [0], [0, 0, 1, 0], [], []>} : vector<8x8xf32>, vector<8x8xf32>, vector<8x8xf32> -> vector<8x8xf32>
    %116 = vector.extract_strided_slice %8 {offsets = [16, 0], sizes = [8, 32], strides = [1, 1]} : vector<32x32xf32> to vector<8x32xf32>
    %cst_38 = arith.constant dense<0.000000e+00> : vector<8x32xf32>
    %117 = tpu.matmul %115, %116, %cst_38 {dimension_numbers = #tpu.dot_dimension_numbers<[1], [0], [0], [1], [0, 0, 1, 1], [], []>} : vector<8x8xf32>, vector<8x32xf32>, vector<8x32xf32> -> vector<8x32xf32>
    %118 = arith.addf %113, %117 : vector<8x32xf32>
    %119 = vector.extract_strided_slice %81 {offsets = [56, 0], sizes = [8, 8], strides = [1, 1]} : vector<64x8xf32> to vector<8x8xf32>
    %cst_39 = arith.constant dense<0.000000e+00> : vector<8x8xf32>
    %120 = tpu.matmul %119, %67, %cst_39 {dimension_numbers = #tpu.dot_dimension_numbers<[1], [1], [0], [0], [0, 0, 1, 0], [], []>} : vector<8x8xf32>, vector<8x8xf32>, vector<8x8xf32> -> vector<8x8xf32>
    %121 = vector.extract_strided_slice %8 {offsets = [24, 0], sizes = [8, 32], strides = [1, 1]} : vector<32x32xf32> to vector<8x32xf32>
    %cst_40 = arith.constant dense<0.000000e+00> : vector<8x32xf32>
    %122 = tpu.matmul %120, %121, %cst_40 {dimension_numbers = #tpu.dot_dimension_numbers<[1], [0], [0], [1], [0, 0, 1, 1], [], []>} : vector<8x8xf32>, vector<8x32xf32>, vector<8x32xf32> -> vector<8x32xf32>
    %123 = arith.addf %118, %122 : vector<8x32xf32>
    %124 = tpu.concatenate %102, %123 in 0 : vector<8x32xf32>, vector<8x32xf32> -> vector<16x32xf32>
    %125 = vector.broadcast %1 : vector<1x32xf32> to vector<16x32xf32>
    %126 = arith.addf %124, %125 : vector<16x32xf32>
    %127 = arith.addf %10, %126 : vector<16x32xf32>
    %cst_41 = arith.constant dense<0.000000e+00> : vector<16xf32>
    %128 = vector.multi_reduction <add>, %127, %cst_41 [1] : vector<16x32xf32> to vector<16xf32>
    %129 = vector.shape_cast %128 : vector<16xf32> to vector<16x1xf32>
    %cst_42 = arith.constant 3.200000e+01 : f32
    %130 = vector.broadcast %cst_42 : f32 to vector<16x1xf32>
    %131 = arith.divf %129, %130 : vector<16x1xf32>
    %132 = vector.broadcast %131 : vector<16x1xf32> to vector<16x32xf32>
    %133 = arith.subf %127, %132 : vector<16x32xf32>
    %134 = arith.mulf %133, %133 : vector<16x32xf32>
    %cst_43 = arith.constant dense<0.000000e+00> : vector<16xf32>
    %135 = vector.multi_reduction <add>, %134, %cst_43 [1] : vector<16x32xf32> to vector<16xf32>
    %136 = vector.shape_cast %135 : vector<16xf32> to vector<16x1xf32>
    %cst_44 = arith.constant 3.200000e+01 : f32
    %137 = vector.broadcast %cst_44 : f32 to vector<16x1xf32>
    %138 = arith.divf %136, %137 : vector<16x1xf32>
    %139 = vector.broadcast %131 : vector<16x1xf32> to vector<16x32xf32>
    %140 = arith.subf %127, %139 : vector<16x32xf32>
    %cst_45 = arith.constant 9.99999996E-13 : f32
    %141 = vector.broadcast %cst_45 : f32 to vector<16x1xf32>
    %142 = arith.addf %138, %141 : vector<16x1xf32>
    %143 = math.rsqrt %142 : vector<16x1xf32>
    %144 = vector.broadcast %143 : vector<16x1xf32> to vector<16x32xf32>
    %145 = arith.mulf %140, %144 : vector<16x32xf32>
    %146 = vector.broadcast %4 : vector<1x32xf32> to vector<16x32xf32>
    %147 = arith.mulf %145, %146 : vector<16x32xf32>
    %148 = vector.broadcast %5 : vector<1x32xf32> to vector<16x32xf32>
    %149 = arith.addf %147, %148 : vector<16x32xf32>
    %c0_46 = arith.constant 0 : index
    %c0_47 = arith.constant 0 : index
    %150 = vector.load %arg6[%c0_46, %c0_47] : memref<32x128xf32, #tpu.memory_space<vmem>>, vector<32x128xf32>
    %cst_48 = arith.constant dense<0.000000e+00> : vector<16x128xf32>
    %151 = tpu.matmul %149, %150, %cst_48 {dimension_numbers = #tpu.dot_dimension_numbers<[1], [0], [0], [1], [0, 0, 1, 1], [], []>} : vector<16x32xf32>, vector<32x128xf32>, vector<16x128xf32> -> vector<16x128xf32>
    %152 = vector.broadcast %2 : vector<1x128xf32> to vector<16x128xf32>
    %153 = arith.addf %151, %152 : vector<16x128xf32>
    %cst_49 = arith.constant 5.000000e-01 : f32
    %154 = vector.broadcast %cst_49 : f32 to vector<16x128xf32>
    %155 = arith.mulf %154, %153 : vector<16x128xf32>
    %cst_50 = arith.constant 0.707106769 : f32
    %156 = vector.broadcast %cst_50 : f32 to vector<16x128xf32>
    %157 = arith.mulf %153, %156 : vector<16x128xf32>
    %cst_51 = arith.constant 0.000000e+00 : f32
    %158 = vector.broadcast %cst_51 : f32 to vector<16x128xf32>
    %159 = arith.cmpf oge, %157, %158 : vector<16x128xf32>
    %cst_52 = arith.constant 1.000000e+00 : f32
    %cst_53 = arith.constant -1.000000e+00 : f32
    %160 = vector.broadcast %cst_52 : f32 to vector<16x128xf32>
    %161 = vector.broadcast %cst_53 : f32 to vector<16x128xf32>
    %162 = arith.select %159, %160, %161 : vector<16x128xi1>, vector<16x128xf32>
    %163 = math.absf %157 : vector<16x128xf32>
    %cst_54 = arith.constant 0.327591091 : f32
    %164 = vector.broadcast %cst_54 : f32 to vector<16x128xf32>
    %165 = arith.mulf %164, %163 : vector<16x128xf32>
    %cst_55 = arith.constant 1.000000e+00 : f32
    %166 = vector.broadcast %cst_55 : f32 to vector<16x128xf32>
    %167 = arith.addf %166, %165 : vector<16x128xf32>
    %168 = tpu.reciprocal %167 : vector<16x128xf32> -> vector<16x128xf32>
    %cst_56 = arith.constant 1.06140542 : f32
    %169 = vector.broadcast %cst_56 : f32 to vector<16x128xf32>
    %170 = arith.mulf %169, %168 : vector<16x128xf32>
    %cst_57 = arith.constant -1.45315206 : f32
    %171 = vector.broadcast %cst_57 : f32 to vector<16x128xf32>
    %172 = arith.addf %170, %171 : vector<16x128xf32>
    %173 = arith.mulf %172, %168 : vector<16x128xf32>
    %cst_58 = arith.constant 1.42141378 : f32
    %174 = vector.broadcast %cst_58 : f32 to vector<16x128xf32>
    %175 = arith.addf %173, %174 : vector<16x128xf32>
    %176 = arith.mulf %175, %168 : vector<16x128xf32>
    %cst_59 = arith.constant -0.284496725 : f32
    %177 = vector.broadcast %cst_59 : f32 to vector<16x128xf32>
    %178 = arith.addf %176, %177 : vector<16x128xf32>
    %179 = arith.mulf %178, %168 : vector<16x128xf32>
    %cst_60 = arith.constant 0.254829586 : f32
    %180 = vector.broadcast %cst_60 : f32 to vector<16x128xf32>
    %181 = arith.addf %179, %180 : vector<16x128xf32>
    %182 = arith.mulf %181, %168 : vector<16x128xf32>
    %cst_61 = arith.constant 0.000000e+00 : f32
    %183 = vector.broadcast %cst_61 : f32 to vector<16x128xf32>
    %184 = arith.subf %183, %163 : vector<16x128xf32>
    %185 = arith.mulf %184, %163 : vector<16x128xf32>
    %186 = math.exp %185 : vector<16x128xf32>
    %187 = arith.mulf %182, %186 : vector<16x128xf32>
    %cst_62 = arith.constant 1.000000e+00 : f32
    %188 = vector.broadcast %cst_62 : f32 to vector<16x128xf32>
    %189 = arith.subf %188, %187 : vector<16x128xf32>
    %190 = arith.mulf %162, %189 : vector<16x128xf32>
    %cst_63 = arith.constant 1.000000e+00 : f32
    %191 = vector.broadcast %cst_63 : f32 to vector<16x128xf32>
    %192 = arith.addf %191, %190 : vector<16x128xf32>
    %193 = arith.mulf %155, %192 : vector<16x128xf32>
    %c0_64 = arith.constant 0 : index
    %c0_65 = arith.constant 0 : index
    %194 = vector.load %arg7[%c0_64, %c0_65] : memref<128x32xf32, #tpu.memory_space<vmem>>, vector<128x32xf32>
    %cst_66 = arith.constant dense<0.000000e+00> : vector<16x32xf32>
    %195 = tpu.matmul %193, %194, %cst_66 {dimension_numbers = #tpu.dot_dimension_numbers<[1], [0], [0], [1], [0, 0, 1, 1], [], []>} : vector<16x128xf32>, vector<128x32xf32>, vector<16x32xf32> -> vector<16x32xf32>
    %196 = vector.broadcast %3 : vector<1x32xf32> to vector<16x32xf32>
    %197 = arith.addf %195, %196 : vector<16x32xf32>
    %198 = arith.addf %149, %197 : vector<16x32xf32>
    %cst_67 = arith.constant dense<0.000000e+00> : vector<16xf32>
    %199 = vector.multi_reduction <add>, %198, %cst_67 [1] : vector<16x32xf32> to vector<16xf32>
    %200 = vector.shape_cast %199 : vector<16xf32> to vector<16x1xf32>
    %cst_68 = arith.constant 3.200000e+01 : f32
    %201 = vector.broadcast %cst_68 : f32 to vector<16x1xf32>
    %202 = arith.divf %200, %201 : vector<16x1xf32>
    %203 = vector.broadcast %202 : vector<16x1xf32> to vector<16x32xf32>
    %204 = arith.subf %198, %203 : vector<16x32xf32>
    %205 = arith.mulf %204, %204 : vector<16x32xf32>
    %cst_69 = arith.constant dense<0.000000e+00> : vector<16xf32>
    %206 = vector.multi_reduction <add>, %205, %cst_69 [1] : vector<16x32xf32> to vector<16xf32>
    %207 = vector.shape_cast %206 : vector<16xf32> to vector<16x1xf32>
    %cst_70 = arith.constant 3.200000e+01 : f32
    %208 = vector.broadcast %cst_70 : f32 to vector<16x1xf32>
    %209 = arith.divf %207, %208 : vector<16x1xf32>
    %210 = vector.broadcast %202 : vector<16x1xf32> to vector<16x32xf32>
    %211 = arith.subf %198, %210 : vector<16x32xf32>
    %cst_71 = arith.constant 9.99999996E-13 : f32
    %212 = vector.broadcast %cst_71 : f32 to vector<16x1xf32>
    %213 = arith.addf %209, %212 : vector<16x1xf32>
    %214 = math.rsqrt %213 : vector<16x1xf32>
    %215 = vector.broadcast %214 : vector<16x1xf32> to vector<16x32xf32>
    %216 = arith.mulf %211, %215 : vector<16x32xf32>
    %217 = vector.broadcast %6 : vector<1x32xf32> to vector<16x32xf32>
    %218 = arith.mulf %216, %217 : vector<16x32xf32>
    %219 = vector.broadcast %7 : vector<1x32xf32> to vector<16x32xf32>
    %220 = arith.addf %218, %219 : vector<16x32xf32>
    %221 = vector.shape_cast %220 : vector<16x32xf32> to vector<2x8x32xf32>
    %c0_72 = arith.constant 0 : index
    %c0_73 = arith.constant 0 : index
    %c0_74 = arith.constant 0 : index
    %222 = vector.load %arg9[%c0_72, %c0_73, %c0_74] : memref<2x8x32xf32, #tpu.memory_space<vmem>>, vector<2x8x32xf32>
    tpu.vector_store %arg9[%c0_72, %c0_73, %c0_74], %221 {strides = array<i32>} : memref<2x8x32xf32, #tpu.memory_space<vmem>>, vector<2x8x32xf32>,
    return
  }
  func.func @transform_0(%arg0: i32) -> (i32, i32, i32) {
    %c0_i32 = arith.constant 0 : i32
    %c0_i32_0 = arith.constant 0 : i32
    %c0_i32_1 = arith.constant 0 : i32
    return %arg0, %c0_i32, %c0_i32_0 : i32, i32, i32
  }
  func.func @transform_1(%arg0: i32) -> (i32, i32, i32) {
    %c0_i32 = arith.constant 0 : i32
    %c0_i32_0 = arith.constant 0 : i32
    %c0_i32_1 = arith.constant 0 : i32
    return %arg0, %c0_i32, %c0_i32_0 : i32, i32, i32
  }
  func.func @transform_2(%arg0: i32) -> (i32, i32) {
    %c0_i32 = arith.constant 0 : i32
    %c0_i32_0 = arith.constant 0 : i32
    %c0_i32_1 = arith.constant 0 : i32
    return %c0_i32, %c0_i32_0 : i32, i32
  }
  func.func @transform_3(%arg0: i32) -> (i32, i32) {
    %c0_i32 = arith.constant 0 : i32
    %c0_i32_0 = arith.constant 0 : i32
    %c0_i32_1 = arith.constant 0 : i32
    return %c0_i32, %c0_i32_0 : i32, i32
  }
  func.func @transform_4(%arg0: i32) -> (i32, i32) {
    %c0_i32 = arith.constant 0 : i32
    %c0_i32_0 = arith.constant 0 : i32
    %c0_i32_1 = arith.constant 0 : i32
    return %c0_i32, %c0_i32_0 : i32, i32
  }
  func.func @transform_5(%arg0: i32) -> (i32, i32) {
    %c0_i32 = arith.constant 0 : i32
    %c0_i32_0 = arith.constant 0 : i32
    %c0_i32_1 = arith.constant 0 : i32
    return %c0_i32, %c0_i32_0 : i32, i32
  }
  func.func @transform_6(%arg0: i32) -> (i32, i32) {
    %c0_i32 = arith.constant 0 : i32
    %c0_i32_0 = arith.constant 0 : i32
    %c0_i32_1 = arith.constant 0 : i32
    return %c0_i32, %c0_i32_0 : i32, i32
  }
  func.func @transform_7(%arg0: i32) -> (i32, i32) {
    %c0_i32 = arith.constant 0 : i32
    %c0_i32_0 = arith.constant 0 : i32
    %c0_i32_1 = arith.constant 0 : i32
    return %c0_i32, %c0_i32_0 : i32, i32
  }
  func.func @transform_8(%arg0: i32) -> (i32, i32, i32) {
    %c0_i32 = arith.constant 0 : i32
    %c0_i32_0 = arith.constant 0 : i32
    %c0_i32_1 = arith.constant 0 : i32
    return %arg0, %c0_i32, %c0_i32_0 : i32, i32, i32
  }
}

</mosaic_0001>

<bundles_post_ra>
// kernel: bert_layer.1
= control target key start
LH: loop header
LB: loop body
LE: loop exit
PB: predicated region body
PF: predicated region fallthrough
CT: control target
= control target key end

     0   :  { %vm121_vm0 = vcmask 261120   ;;  %v1725_v2 = vmov 0   ;;  %s2153_s0 = inlined_call_operand.vmem [shape: f32[2,8,32], index: 0, kind: input, shape index: {}]   ;;  %s2154_s1 = inlined_call_operand.vmem [shape: f32[2,1,8], index: 1, kind: input, shape index: {}]   ;;  %s2155_s2 = inlined_call_operand.vmem [shape: f32[96,32], index: 2, kind: input, shape index: {}]   ;;  %s2156_s3 = inlined_call_operand.vmem [shape: f32[96,1], index: 3, kind: input, shape index: {}]   ;;  %s2157_s4 = inlined_call_operand.vmem [shape: f32[32,32], index: 4, kind: input, shape index: {}]   ;;  %s2158_s5 = inlined_call_operand.vmem [shape: f32[32,128], index: 5, kind: input, shape index: {}]   ;;  %s2159_s6 = inlined_call_operand.vmem [shape: f32[128,32], index: 6, kind: input, shape index: {}]   ;;  %s2160_s7 = inlined_call_operand.vmem [shape: f32[8,128], index: 7, kind: input, shape index: {}]   ;;  %s2161_s8 = inlined_call_operand.hbm [shape: f32[2,8,32], index: 8, kind: output, shape index: {}]  }
   0x1   :  { %v1780_v0 = vld [vmem:[%s2153_s0 + $0x8] sm:$0xff]  ;;  %1634 = vset.pattern.permute.xlu0 %v1725_v2  ;;  %v1790_v3 = vld [vmem:[%s2153_s0] sm:$0xff]  ;;  %1635 = vset.pattern.permute.xlu1 %v1725_v2 }
   0x2   :  { %v50_v1 = vld [vmem:[%s2156_s3 + $0x8] sm:$0xff]  ;;  %1576 = vmatpush.xpose.msk.msra.mxu0 %vm121_vm0, %v1780_v0  ;;  %1624 = vmatpush.xpose.msk.msra.mxu3 %vm121_vm0, %v1780_v0 }
   0x3   :  { %68 = vperm.xlu0 %1634, %v50_v1   ;;  %v54_v4 = vld [vmem:[%s2156_s3 + $0x28] sm:$0xff] }
   0x4   :  { %88 = vperm.xlu1 %1635, %v54_v4  }
   0x5   :  { %13 = vsyncpa [#allocation3], 0  ;;  %v37_v5 = vld [vmem:[%s2155_s2] sm:$0xff]  ;;  %v51_v6 = vld [vmem:[%s2156_s3 + $0x10] sm:$0xff]  ;;  %s1726_s10 = smov 120   ;;  %vm254_vm1 = vcmask 64512  }
   0x6   :  { %1577 = vmatpush.xpose.msk.msra.mxu0 %vm121_vm0, %v1790_v3  ;;  %1625 = vmatpush.xpose.msk.msra.mxu3 %vm121_vm0, %v1790_v3  ;;  %v55_v7 = vld [vmem:[%s2156_s3 + $0x30] sm:$0xff]  ;;  %v38_v8 = vld [vmem:[%s2155_s2 + $0x8] sm:$0xff]  ;;  %v49_v9 = vld [vmem:[%s2156_s3] sm:$0xff]  ;;  %s1564_s11 = sshll.u32 %s2161_s8, 4  ;;  %s1730_s12 = smov 128   ;;  %s1565_s11 = int_to_ptr.hbm [resolvable:$true] %s1564_s11 }
   0x7   :  { %v53_v10 = vld [vmem:[%s2156_s3 + $0x20] sm:$0xff]  ;;  %v39_v11 = vld [vmem:[%s2155_s2 + $0x10] sm:$0xff]  ;;  %v40_v13 = vld [vmem:[%s2155_s2 + $0x18] sm:$0xff]  ;;  %s1731_s13 = smov 8  }
   0x8   :  { %v41_v15 = vld [vmem:[%s2155_s2 + $0x20] sm:$0xff]  ;;  %v42_v19 = vld [vmem:[%s2155_s2 + $0x28] sm:$0xff]  ;;  %v43_v22 = vld [vmem:[%s2155_s2 + $0x30] sm:$0xff] }
   0x9   :  { %1578 = vmatmul.msk.f32.vlgmr.msra.gmra.mxu0 %vm121_vm0, %v37_v5  ;;  %v44_v25 = vld [vmem:[%s2155_s2 + $0x38] sm:$0xff]  ;;  %v45_v26 = vld [vmem:[%s2155_s2 + $0x40] sm:$0xff]  ;;  %v46_v27 = vld [vmem:[%s2155_s2 + $0x48] sm:$0xff] }
   0xa   :  { %v47_v29 = vld [vmem:[%s2155_s2 + $0x50] sm:$0xff]  ;;  %v48_v30 = vld [vmem:[%s2155_s2 + $0x58] sm:$0xff]  ;;  %v58_v35 = vld [vmem:[%s2156_s3 + $0x48] sm:$0xff] }
   0xb   :  { %73 = vperm.xlu0 %1634, %v51_v6   ;;  %v56_v31 = vld [vmem:[%s2156_s3 + $0x38] sm:$0xff]  ;;  %1589 = vmatmul.msk.f32.vlgmr.msra.gmra.mxu3 %vm121_vm0, %v48_v30  ;;  %v59_v38 = vld [vmem:[%s2156_s3 + $0x50] sm:$0xff]  ;;  %v1887_v54 = vld [vmem:[%s2154_s1] ss:$0 sm:$0xff] }
   0xc   :  { %93 = vperm.xlu1 %1635, %v55_v7   ;;  %v52_v32 = vld [vmem:[%s2156_s3 + $0x18] sm:$0xff] }
  0x11   :  { %1579 = vmatmul.msk.f32.gmra.mxu0 %vm121_vm0, %v38_v8 }
  0x13   :  { %63 = vperm.xlu0 %1634, %v49_v9  }
  0x14   :  { %83 = vperm.xlu1 %1635, %v53_v10  }
  0x19   :  { %1580 = vmatmul.msk.f32.gmra.mxu0 %vm121_vm0, %v39_v11 }
  0x21   :  { %1581 = vmatmul.msk.f32.gmra.mxu0 %vm121_vm0, %v40_v13 }
  0x29   :  { %1582 = vmatmul.msk.f32.gmra.mxu0 %vm121_vm0, %v41_v15 }
  0x31   :  { %1583 = vmatmul.msk.f32.gmra.mxu0 %vm121_vm0, %v42_v19 }
  0x39   :  { %1584 = vmatmul.msk.f32.gmra.mxu0 %vm121_vm0, %v43_v22 }
  0x41   :  { %1585 = vmatmul.msk.f32.gmra.mxu0 %vm121_vm0, %v44_v25 }
  0x49   :  { %1586 = vmatmul.msk.f32.gmra.mxu0 %vm121_vm0, %v45_v26 }
  0x51   :  { %1587 = vmatmul.msk.f32.gmra.mxu0 %vm121_vm0, %v46_v27 }
  0x59   :  { %1588 = vmatmul.msk.f32.gmra.mxu0 %vm121_vm0, %v47_v29  ;;  %v1917_v29 = vld [vmem:[%s2154_s1 + $0x1] ss:$0 sm:$0xff] }
  0x75   :  { %v69_v12 = vpop.permute.xlu0 %68 }
  0x76   :  { %v89_v34 = vpop.permute.xlu1 %88 }
  0x7d   :  { %v74_v14 = vpop.permute.xlu0 %73 }
  0x7e   :  { %v94_v39 = vpop.permute.xlu1 %93 }
  0x85   :  { %v64_v16 = vpop.permute.xlu0 %63 }
  0x86   :  { %v181_v17 = vpop.f32.mrf.mxu0  ;;  %v84_v44 = vpop.permute.xlu1 %83 }
  0x87   :  { %v182_v18 = vadd.f32 %v181_v17, %v64_v16 }
  0x89   :  { %222 = vxpose.xlu1.b32.start.end [1/1] (short) (narrow) %v182_v18, 8  ;;  %447 = vrot.lane.b32.xlu0 %v182_v18, %s1726_s10 }
  0x8e   :  { %v184_v20 = vpop.f32.mrf.mxu0  ;;  %v1882_v52 = vpop.f32.mrf.mxu3 }
  0x8f   :  { %v185_v21 = vadd.f32 %v184_v20, %v69_v12 }
  0x91   :  { %278 = vxpose.xlu2.b32.start.end [1/1] (short) (narrow) %v185_v21, 8 }
  0x96   :  { %v187_v23 = vpop.f32.mrf.mxu0 }
  0x97   :  { %v188_v24 = vadd.f32 %v187_v23, %v74_v14 }
  0x99   :  { %333 = vxpose.xlu2.b32.start.end [1/1] (short) (narrow) %v188_v24, 8 }
  0x9e   :  { %v190_v28 = vpop.f32.mrf.mxu0 }
  0xa6   :  { %v193_v33 = vpop.f32.mrf.mxu0 }
  0xa7   :  { %v194_v45 = vadd.f32 %v193_v33, %v84_v44 }
  0xa9   :  { %273 = vmatpush.msra.mxu1 %v194_v45 }
  0xae   :  { %v196_v36 = vpop.f32.mrf.mxu0 }
  0xaf   :  { %v1871_v37 = vadd.f32 %v196_v36, %v89_v34 }
  0xb1   :  { %328 = vmatpush.msrb.mxu3 %v1871_v37 }
  0xb6   :  { %v199_v40 = vpop.f32.mrf.mxu0 }
  0xb7   :  { %v200_v41 = vadd.f32 %v199_v40, %v94_v39 }
  0xb9   :  { %383 = vmatpush.msra.mxu3 %v200_v41  ;;  %v1637_v58 = vpack.i.bf16 %v200_v41, %v194_v45 }
  0xbe   :  { %v202_v49 = vpop.f32.mrf.mxu0 }
  0xc6   :  { %v1896_v8 = vpop.f32.mrf.mxu0 }
  0xce   :  { %v208_v10 = vpop.f32.mrf.mxu0 }
  0xd6   :  { %v211_v14 = vpop.f32.mrf.mxu0 }
  0xe3   :  { %98 = vperm.xlu1 %1635, %v56_v31  }
  0xeb   :  { %113 = vperm.xlu1 %1635, %v59_v38  }
  0xfb   :  { %1636 = vset.pattern.permute.xlu2 %v1725_v2  ;;  %v448_v60 = vpop.permute.xlu0 %447 }
 0x102   :  { %78 = vperm.xlu2 %1636, %v52_v32  }
 0x10a   :  { %108 = vperm.xlu2 %1636, %v58_v35   ;;  %v57_v35 = vld [vmem:[%s2156_s3 + $0x40] sm:$0xff] }
 0x112   :  { %573 = vrot.lane.b32.xlu2 %v188_v24, %s1726_s10 }
 0x11a   :  { %510 = vrot.lane.b32.xlu2 %v185_v21, %s1726_s10 }
 0x12a   :  { %v294_v42 = vpop.trf.xlu2 }
 0x12b   :  { %1591 = vmatmul.msk.f32.vlgmr.msrb.gmra.mxu3 %vm254_vm1, %v294_v42 }
 0x12d   :  { %v238_v47 = vpop.trf.xlu1 }
 0x12e   :  { %1590 = vmatmul.msk.f32.vlgmr.msra.gmra.mxu1 %vm254_vm1, %v238_v47 }
 0x132   :  { %v349_v43 = vpop.trf.xlu2 }
 0x133   :  { %1592 = vmatmul.msk.f32.vlgmr.msra.gmra.mxu3 %vm254_vm1, %v349_v43 }
 0x155   :  { %v99_v50 = vpop.permute.xlu1 %98 }
 0x156   :  { %v203_v51 = vadd.f32 %v202_v49, %v99_v50 }
 0x158   :  { %438 = vmatpush.msrb.mxu1 %v203_v51  ;;  %v1642_v27 = vpack.i.bf16 %v203_v51, %v1871_v37 }
 0x15c   :  { %v79_v46 = vpop.permute.xlu2 %78 }
 0x15d   :  { %v191_v48 = vadd.f32 %v190_v28, %v79_v46  ;;  %v114_v7 = vpop.permute.xlu1 %113 }
 0x15e   :  { %v1903_v15 = vadd.f32 %v211_v14, %v114_v7 }
 0x15f   :  { %388 = vxpose.xlu0.b32.start.end [1/1] (short) (narrow) %v191_v48, 8 }
 0x164   :  { %v109_v59 = vpop.permute.xlu2 %108 }
 0x165   :  { %v1898_v12 = vadd.f32 %v208_v10, %v109_v59 }
 0x16c   :  { %v574_v61 = vpop.permute.xlu2 %573 }
 0x174   :  { %v511_v62 = vpop.permute.xlu2 %510 }
 0x1ab   :  { %v275_v26 = vpop.f32.mrf.mxu1 }
 0x1ac   :  { %v276_v33 = vadd.f32 %v1887_v54, %v275_v26 }
 0x1ae   :  { %v330_v53 = vpop.f32.mrf.mxu3  ;;  %v698_v34 = vsel %vm254_vm1, %v276_v33, -inf }
 0x1af   :  { %v331_v5 = vadd.f32 %v1887_v54, %v330_v53 }
 0x1b1   :  { %v701_v6 = vsel %vm254_vm1, %v331_v5, -inf }
 0x1b6   :  { %v385_v55 = vpop.f32.mrf.mxu3 }
 0x1b7   :  { %v386_v56 = vadd.f32 %v1887_v54, %v385_v55 }
 0x1b9   :  { %v704_v57 = vsel %vm254_vm1, %v386_v56, -inf }
 0x1ba   :  { %705 = vmax.xlane.f32.xlu1 %v704_v57 }
 0x1cd   :  { %1638 = vrot.lane.b32.xlu0 %v1637_v58, %s1726_s10 }
 0x1d3   :  { %636 = vrot.lane.b32.xlu1 %v191_v48, %s1726_s10 }
 0x1ef   :  { %450 = vxpose.xlu0.b32.start.end [1/1] (short) (narrow) %v448_v60, 8 }
 0x1f7   :  { %576 = vxpose.xlu0.b32.start.end [1/1] (short) (narrow) %v574_v61, 8 }
 0x203   :  { %v404_v63 = vpop.trf.xlu0 }
 0x204   :  { %1593 = vmatmul.msk.f32.vlgmr.msrb.gmra.mxu1 %vm254_vm1, %v404_v63 }
 0x208   :  { %513 = vxpose.xlu1.b32.start.end [1/1] (short) (narrow) %v511_v62, 8 }
 0x22d   :  { %v706_v9 = vpop.xlane.xlu1 %705 }
 0x22e   :  { %v724_v19 = vsub.f32 %v386_v56, %v706_v9 }
 0x230   :  { %v734_v21 = vmul.f32 1.442695, %v724_v19 }
 0x23f   :  { %v1639_v1 = vpop.permute.xlu0 %1638 }
 0x240   :  { %v1641_v2 = vunpack.i.h.bf16 %v1639_v1  ;;  %v1640_v4 = vunpack.i.l.bf16 %v1639_v1 }
 0x242   :  { %504 = vmatpush.msra.mxu1 %v1640_v4 }
 0x244   :  { %630 = vmatpush.msrb.mxu1 %v1641_v2 }
 0x245   :  { %v637_v11 = vpop.permute.xlu1 %636 }
 0x268   :  { %702 = vmax.xlane.f32.xlu0 %v701_v6 }
 0x281   :  { %v1911_v28 = vpop.f32.mrf.mxu1 }
 0x291   :  { %639 = vxpose.xlu0.b32.start.end [1/1] (short) (narrow) %v637_v11, 8 }
 0x293   :  { %v466_v13 = vpop.trf.xlu0 }
 0x294   :  { %1594 = vmatmul.msk.f32.vlgmr.msra.gmra.mxu1 %vm254_vm1, %v466_v13 }
 0x295   :  { %1600 = vmatpush.xpose.msk.msra.mxu1 %vm254_vm1, %v1898_v12 }
 0x29b   :  { %v592_v16 = vpop.trf.xlu0 }
 0x29c   :  { %1596 = vmatmul.msk.f32.vlgmr.msrb.gmra.mxu1 %vm254_vm1, %v592_v16 }
 0x29d   :  { %1604 = vmatpush.xpose.msk.msrb.mxu1 %vm254_vm1, %v1903_v15 }
 0x2ac   :  { %v529_v53 = vpop.trf.xlu1 }
 0x2db   :  { %v703_v17 = vpop.xlane.xlu0 %702 }
 0x2dc   :  { %v723_v18 = vsub.f32 %v331_v5, %v703_v17 }
 0x2de   :  { %v732_v20 = vmul.f32 1.442695, %v723_v18 }
 0x2e0   :  { %1649 = vpow2.f32 %v732_v20  ;;  %v1941_v20 = vld [vmem:[%s2157_s4 + $0x8] sm:$0xff] }
 0x2e1   :  { %1651 = vpow2.f32 %v734_v21  ;;  %v1951_v21 = vld [vmem:[%s2157_s4 + $0x10] sm:$0xff] }
 0x2e6   :  { %v1650_v22 = vpop.eup %1649 }
 0x2e7   :  { %v749_v23 = vsel %vm254_vm1, %v1650_v22, 0.0  ;;  %v1652_v24 = vpop.eup %1651 }
 0x2e8   :  { %750 = vadd.xlane.f32.xlu2 %v749_v23  ;;  %v752_v25 = vsel %vm254_vm1, %v1652_v24, 0.0 }
 0x2f0   :  { %753 = vadd.xlane.f32.xlu2 %v752_v25 }
 0x308   :  { %1643 = vrot.lane.b32.xlu2 %v1642_v27, %s1726_s10 }
 0x311   :  { %v506_v30 = vpop.f32.mrf.mxu1 }
 0x312   :  { %v507_v31 = vadd.f32 %v1917_v29, %v506_v30 }
 0x314   :  { %v710_v32 = vsel %vm254_vm1, %v507_v31, -inf }
 0x315   :  { %711 = vmax.xlane.f32.xlu0 %v710_v32 }
 0x319   :  { %v632_v23 = vpop.f32.mrf.mxu1 }
 0x31a   :  { %v1969_v32 = vadd.f32 %v1917_v29, %v632_v23 }
 0x331   :  { %699 = vmax.xlane.f32.xlu2 %v698_v34 }
 0x335   :  { %v655_v56 = vpop.trf.xlu0 }
 0x349   :  { %103 = vperm.xlu2 %1636, %v57_v35   ;;  %v60_v35 = vld [vmem:[%s2156_s3 + $0x58] sm:$0xff] }
 0x35b   :  { %v751_v36 = vpop.xlane.xlu2 %750 }
 0x35c   :  { %1653 = vrcp.f32 %v751_v36  ;;  %v795_v41 = vand.u32 2147483648, %v751_v36  ;;  %v793_v43 = vand.u32 2147483647, %v751_v36  ;;  %vm789_vm3 = vweird.f32 %v751_v36 }
 0x35e   :  { %v796_v46 = vor.u32 1.1754944e-38, %v795_v41  ;;  %vm794_vm5 = vcmp.eq.f32.partialorder %v793_v43, 8.507059e+37 }
 0x362   :  { %v1654_v37 = vpop.eup %1653 }
 0x363   :  { %v785_v38 = vmul.f32 %v1654_v37, %v751_v36  ;;  %v754_v39 = vpop.xlane.xlu2 %753  ;;  %vm790_vm2 = vweird.f32 %v1654_v37 }
 0x364   :  { %1655 = vrcp.f32 %v754_v39  ;;  %vm791_vm4 = vmor %vm789_vm3, %vm790_vm2  ;;  %v809_v59 = vand.u32 2147483648, %v754_v39  ;;  %v807_v61 = vand.u32 2147483647, %v754_v39  ;;  %vm803_vm7 = vweird.f32 %v754_v39 }
 0x365   :  { %v786_v40 = vsub.f32 1.0, %v785_v38 }
 0x366   :  { %v810_v63 = vor.u32 1.1754944e-38, %v809_v59  ;;  %vm808_vm9 = vcmp.eq.f32.partialorder %v807_v61, 8.507059e+37 }
 0x367   :  { %v787_v42 = vmul.f32 %v1654_v37, %v786_v40 }
 0x369   :  { %v788_v44 = vadd.f32 %v1654_v37, %v787_v42 }
 0x36a   :  { %v1656_v45 = vpop.eup %1655 }
 0x36b   :  { %v792_v47 = vsel %vm791_vm4, %v1654_v37, %v788_v44  ;;  %v799_v48 = vmul.f32 %v1656_v45, %v754_v39  ;;  %v1644_v49 = vpop.permute.xlu2 %1643  ;;  %vm804_vm6 = vweird.f32 %v1656_v45 }
 0x36c   :  { %v797_v50 = vsel %vm794_vm5, %v796_v46, %v792_v47  ;;  %v1645_v51 = vunpack.i.l.bf16 %v1644_v49  ;;  %v1646_v55 = vunpack.i.h.bf16 %v1644_v49  ;;  %vm805_vm8 = vmor %vm803_vm7, %vm804_vm6 }
 0x36d   :  { %v800_v57 = vsub.f32 1.0, %v799_v48  ;;  %v883_v58 = vmul.f32 %v1650_v22, %v797_v50 }
 0x36e   :  { %567 = vmatpush.msrb.mxu3 %v1645_v51  ;;  %693 = vmatpush.msra.mxu2 %v1646_v55 }
 0x36f   :  { %v801_v60 = vmul.f32 %v1656_v45, %v800_v57  ;;  %1595 = vmatmul.msk.f32.vlgmr.msrb.gmra.mxu3 %vm254_vm1, %v529_v53  ;;  %1597 = vmatmul.msk.f32.vlgmr.msra.gmra.mxu2 %vm254_vm1, %v655_v56 }
 0x370   :  { %1601 = vmatmul.msk.f32.vlgmr.msra.gmra.mxu1 %vm254_vm1, %v883_v58  ;;  %960 = vmatpush.msrb.mxu2 %v1941_v20 }
 0x371   :  { %v802_v62 = vadd.f32 %v1656_v45, %v801_v60 }
 0x372   :  { %1032 = vmatpush.msra.mxu2 %v1951_v21 }
 0x373   :  { %v806_v1 = vsel %vm805_vm8, %v1656_v45, %v802_v62 }
 0x374   :  { %v811_v2 = vsel %vm808_vm9, %v810_v63, %v806_v1 }
 0x375   :  { %v884_v4 = vmul.f32 %v1652_v24, %v811_v2  ;;  %v31_v2 = vld [vmem:[%s2157_s4] sm:$0xff] }
 0x378   :  { %1605 = vmatmul.msk.f32.vlgmr.msrb.gmra.mxu1 %vm254_vm1, %v884_v4 }
 0x388   :  { %v712_v5 = vpop.xlane.xlu0 %711 }
 0x389   :  { %v726_v6 = vsub.f32 %v507_v31, %v712_v5 }
 0x38b   :  { %v738_v7 = vmul.f32 1.442695, %v726_v6 }
 0x38d   :  { %1657 = vpow2.f32 %v738_v7 }
 0x393   :  { %v1658_v9 = vpop.eup %1657 }
 0x394   :  { %v758_v10 = vsel %vm254_vm1, %v1658_v9, 0.0 }
 0x395   :  { %759 = vadd.xlane.f32.xlu2 %v758_v10 }
 0x3a4   :  { %v700_v11 = vpop.xlane.xlu2 %699 }
 0x3a5   :  { %v722_v13 = vsub.f32 %v276_v33, %v700_v11  ;;  %v716_v33 = vsel %vm254_vm1, %v1969_v32, -inf }
 0x3a7   :  { %v730_v14 = vmul.f32 1.442695, %v722_v13 }
 0x3a9   :  { %1659 = vpow2.f32 %v730_v14 }
 0x3ac   :  { %v104_v16 = vpop.permute.xlu2 %103 }
 0x3ad   :  { %v206_v17 = vadd.f32 %v1896_v8, %v104_v16  ;;  %v1946_v8 = vadd.f32 %v1887_v54, %v1911_v28 }
 0x3af   :  { %v1932_v18 = vpop.eup %1659  ;;  %1598 = vmatpush.xpose.msk.msra.mxu3 %vm254_vm1, %v206_v17  ;;  %1088 = vrot.lane.b32.xlu2 %v206_v17, %s1726_s10  ;;  %v707_v22 = vsel %vm254_vm1, %v1946_v8, -inf }
 0x3b0   :  { %v746_v19 = vsel %vm254_vm1, %v1932_v18, 0.0 }
 0x3b1   :  { %747 = vadd.xlane.f32.xlu1 %v746_v19 }
 0x3b3   :  { %983 = vmatpush.msrb.mxu3 %v31_v2 }
 0x3d8   :  { %708 = vmax.xlane.f32.xlu2 %v707_v22 }
 0x3ed   :  { %v939_v24 = vpop.f32.mrf.mxu1 }
 0x3ee   :  { %1602 = vmatmul.msk.f32.vlgmr.msrb.gmra.mxu2 %vm254_vm1, %v939_v24 }
 0x3f2   :  { %v569_v25 = vpop.f32.mrf.mxu3  ;;  %v695_v26 = vpop.f32.mrf.mxu2 }
 0x3f3   :  { %v1958_v54 = vadd.f32 %v1917_v29, %v569_v25  ;;  %v1961_v27 = vadd.f32 %v1917_v29, %v695_v26 }
 0x3f5   :  { %v1011_v28 = vpop.f32.mrf.mxu1  ;;  %v719_v30 = vsel %vm254_vm1, %v1961_v27, -inf  ;;  %v713_v31 = vsel %vm254_vm1, %v1958_v54, -inf }
 0x3f6   :  { %1606 = vmatmul.msk.f32.vlgmr.msra.gmra.mxu2 %vm254_vm1, %v1011_v28  ;;  %720 = vmax.xlane.f32.xlu1 %v719_v30 }
 0x3f7   :  { %714 = vmax.xlane.f32.xlu0 %v713_v31 }
 0x3ff   :  { %717 = vmax.xlane.f32.xlu0 %v716_v33 }
 0x408   :  { %v760_v34 = vpop.xlane.xlu2 %759 }
 0x409   :  { %1661 = vrcp.f32 %v760_v34  ;;  %v837_v40 = vand.u32 2147483648, %v760_v34  ;;  %v835_v41 = vand.u32 2147483647, %v760_v34  ;;  %vm831_vm11 = vweird.f32 %v760_v34 }
 0x40b   :  { %v838_v43 = vor.u32 1.1754944e-38, %v837_v40  ;;  %vm836_vm13 = vcmp.eq.f32.partialorder %v835_v41, 8.507059e+37 }
 0x40f   :  { %v1662_v36 = vpop.eup %1661  ;;  %118 = vperm.xlu1 %1635, %v60_v35  }
 0x410   :  { %v827_v37 = vmul.f32 %v1662_v36, %v760_v34  ;;  %v1089_v38 = vpop.permute.xlu2 %1088  ;;  %vm832_vm10 = vweird.f32 %v1662_v36 }
 0x411   :  { %1610 = vmatpush.xpose.msk.msrb.mxu2 %vm254_vm1, %v1089_v38  ;;  %vm833_vm12 = vmor %vm831_vm11, %vm832_vm10 }
 0x412   :  { %v828_v39 = vsub.f32 1.0, %v827_v37 }
 0x414   :  { %v829_v29 = vmul.f32 %v1662_v36, %v828_v39 }
 0x415   :  { %1183 = vmatpush.msra.mxu2 %v31_v2 }
 0x416   :  { %v830_v42 = vadd.f32 %v1662_v36, %v829_v29 }
 0x417   :  { %1115 = vrot.lane.b32.xlu1 %v1898_v12, %s1726_s10 }
 0x418   :  { %v834_v44 = vsel %vm833_vm12, %v1662_v36, %v830_v42 }
 0x419   :  { %v839_v45 = vsel %vm836_vm13, %v838_v43, %v834_v44 }
 0x41a   :  { %v886_v46 = vmul.f32 %v1658_v9, %v839_v45 }
 0x41c   :  { %1611 = vmatmul.msk.f32.vlgmr.msrb.gmra.mxu2 %vm254_vm1, %v886_v46 }
 0x424   :  { %v748_v47 = vpop.xlane.xlu1 %747 }
 0x425   :  { %1663 = vrcp.f32 %v748_v47  ;;  %v781_v51 = vand.u32 2147483648, %v748_v47  ;;  %v779_v55 = vand.u32 2147483647, %v748_v47  ;;  %vm775_vm15 = vweird.f32 %v748_v47 }
 0x427   :  { %v782_v57 = vor.u32 1.1754944e-38, %v781_v51  ;;  %vm780_vm3 = vcmp.eq.f32.partialorder %v779_v55, 8.507059e+37 }
 0x42b   :  { %v1664_v48 = vpop.eup %1663 }
 0x42c   :  { %v771_v49 = vmul.f32 %v1664_v48, %v748_v47  ;;  %vm776_vm14 = vweird.f32 %v1664_v48 }
 0x42d   :  { %vm777_vm2 = vmor %vm775_vm15, %vm776_vm14 }
 0x42e   :  { %v772_v50 = vsub.f32 1.0, %v771_v49 }
 0x430   :  { %v773_v53 = vmul.f32 %v1664_v48, %v772_v50 }
 0x432   :  { %v774_v56 = vadd.f32 %v1664_v48, %v773_v53 }
 0x434   :  { %v778_v12 = vsel %vm777_vm2, %v1664_v48, %v774_v56 }
 0x435   :  { %v783_v58 = vsel %vm780_vm3, %v782_v57, %v778_v12 }
 0x436   :  { %v882_v59 = vmul.f32 %v1932_v18, %v783_v58 }
 0x438   :  { %1599 = vmatmul.msk.f32.vlgmr.msra.gmra.mxu3 %vm254_vm1, %v882_v59 }
 0x44b   :  { %v709_v60 = vpop.xlane.xlu2 %708 }
 0x44c   :  { %v725_v61 = vsub.f32 %v1946_v8, %v709_v60 }
 0x44e   :  { %v736_v62 = vmul.f32 1.442695, %v725_v61 }
 0x450   :  { %1665 = vpow2.f32 %v736_v62 }
 0x456   :  { %v1666_v63 = vpop.eup %1665 }
 0x457   :  { %v755_v1 = vsel %vm254_vm1, %v1666_v63, 0.0 }
 0x458   :  { %756 = vadd.xlane.f32.xlu0 %v755_v1 }
 0x469   :  { %v721_v4 = vpop.xlane.xlu1 %720 }
 0x46a   :  { %v715_v5 = vpop.xlane.xlu0 %714  ;;  %v729_v7 = vsub.f32 %v1961_v27, %v721_v4 }
 0x46b   :  { %v727_v6 = vsub.f32 %v1958_v54, %v715_v5 }
 0x46c   :  { %v744_v10 = vmul.f32 1.442695, %v729_v7 }
 0x46d   :  { %v740_v9 = vmul.f32 1.442695, %v727_v6 }
 0x46f   :  { %1667 = vpow2.f32 %v740_v9 }
 0x470   :  { %1669 = vpow2.f32 %v744_v10 }
 0x471   :  { %v2004_v25 = vpop.f32.mrf.mxu2 }
 0x472   :  { %v718_v11 = vpop.xlane.xlu0 %717 }
 0x473   :  { %v728_v13 = vsub.f32 %v1969_v32, %v718_v11 }
 0x475   :  { %v1990_v14 = vpop.eup %1667  ;;  %v742_v16 = vmul.f32 1.442695, %v728_v13 }
 0x476   :  { %v761_v17 = vsel %vm254_vm1, %v1990_v14, 0.0  ;;  %v1994_v18 = vpop.eup %1669 }
 0x477   :  { %1671 = vpow2.f32 %v742_v16  ;;  %762 = vadd.xlane.f32.xlu0 %v761_v17  ;;  %v767_v8 = vsel %vm254_vm1, %v1994_v18, 0.0 }
 0x479   :  { %v2007_v26 = vpop.f32.mrf.mxu2 }
 0x47d   :  { %v1996_v19 = vpop.eup %1671 }
 0x47e   :  { %v764_v22 = vsel %vm254_vm1, %v1996_v19, 0.0 }
 0x47f   :  { %768 = vadd.xlane.f32.xlu0 %v767_v8  ;;  %765 = vadd.xlane.f32.xlu2 %v764_v22  ;;  %v34_v22 = vld [vmem:[%s2157_s4 + $0x18] sm:$0xff] }
 0x480   :  { %1082 = vmatpush.msra.mxu1 %v34_v22 }
 0x481   :  { %v119_v23 = vpop.permute.xlu1 %118 }
 0x482   :  { %v215_v24 = vadd.f32 %v1882_v52, %v119_v23  ;;  %1160 = vmatpush.msrb.mxu1 %v1941_v20  ;;  %v2036_v20 = vld [vmem:[%s2160_s7] sm:$0xff] }
 0x484   :  { %1607 = vmatpush.xpose.msk.msra.mxu3 %vm254_vm1, %v215_v24 }
 0x489   :  { %v1116_v28 = vpop.permute.xlu1 %1115 }
 0x493   :  { %1239 = vrot.lane.b32.xlu0 %v215_v24, %s1726_s10 }
 0x497   :  { %1188 = vrot.lane.b32.xlu2 %v1903_v15, %s1726_s10 }
 0x49f   :  { %v1112_v54 = vpop.f32.mrf.mxu2 }
 0x4a0   :  { %1615 = vmatmul.msk.f32.vlgmr.msra.gmra.mxu2 %vm254_vm1, %v1112_v54 }
 0x4bb   :  { %v913_v27 = vpop.f32.mrf.mxu3 }
 0x4bc   :  { %1603 = vmatmul.msk.f32.vlgmr.msrb.gmra.mxu3 %vm254_vm1, %v913_v27 }
 0x4bd   :  { %1612 = vmatpush.xpose.msk.msrb.mxu3 %vm254_vm1, %v1116_v28 }
 0x4cb   :  { %v757_v52 = vpop.xlane.xlu0 %756 }
 0x4cc   :  { %1673 = vrcp.f32 %v757_v52  ;;  %v823_v33 = vand.u32 2147483648, %v757_v52  ;;  %v821_v35 = vand.u32 2147483647, %v757_v52  ;;  %vm817_vm5 = vweird.f32 %v757_v52 }
 0x4ce   :  { %v824_v15 = vor.u32 1.1754944e-38, %v823_v33  ;;  %vm822_vm7 = vcmp.eq.f32.partialorder %v821_v35, 8.507059e+37 }
 0x4d2   :  { %v1674_v30 = vpop.eup %1673 }
 0x4d3   :  { %v813_v31 = vmul.f32 %v1674_v30, %v757_v52  ;;  %vm818_vm4 = vweird.f32 %v1674_v30 }
 0x4d4   :  { %vm819_vm6 = vmor %vm817_vm5, %vm818_vm4 }
 0x4d5   :  { %v814_v32 = vsub.f32 1.0, %v813_v31 }
 0x4d7   :  { %v815_v34 = vmul.f32 %v1674_v30, %v814_v32 }
 0x4d9   :  { %v816_v36 = vadd.f32 %v1674_v30, %v815_v34 }
 0x4db   :  { %v820_v37 = vsel %vm819_vm6, %v1674_v30, %v816_v36 }
 0x4dc   :  { %v825_v38 = vsel %vm822_vm7, %v824_v15, %v820_v37 }
 0x4dd   :  { %v885_v39 = vmul.f32 %v1666_v63, %v825_v38 }
 0x4df   :  { %1608 = vmatmul.msk.f32.vlgmr.msra.gmra.mxu3 %vm254_vm1, %v885_v39 }
 0x4ea   :  { %v763_v40 = vpop.xlane.xlu0 %762 }
 0x4eb   :  { %1675 = vrcp.f32 %v763_v40  ;;  %v851_v45 = vand.u32 2147483648, %v763_v40  ;;  %v849_v47 = vand.u32 2147483647, %v763_v40  ;;  %vm845_vm9 = vweird.f32 %v763_v40 }
 0x4ed   :  { %v852_v50 = vor.u32 1.1754944e-38, %v851_v45  ;;  %vm850_vm11 = vcmp.eq.f32.partialorder %v849_v47, 8.507059e+37 }
 0x4f1   :  { %v1676_v29 = vpop.eup %1675 }
 0x4f2   :  { %v841_v41 = vmul.f32 %v1676_v29, %v763_v40  ;;  %v766_v42 = vpop.xlane.xlu2 %765  ;;  %v769_v43 = vpop.xlane.xlu0 %768  ;;  %vm846_vm8 = vweird.f32 %v1676_v29 }
 0x4f3   :  { %1677 = vrcp.f32 %v766_v42  ;;  %vm847_vm10 = vmor %vm845_vm9, %vm846_vm8  ;;  %v865_v60 = vand.u32 2147483648, %v766_v42  ;;  %v863_v63 = vand.u32 2147483647, %v766_v42  ;;  %v879_v1 = vand.u32 2147483648, %v769_v43 }
 0x4f4   :  { %v842_v44 = vsub.f32 1.0, %v841_v41  ;;  %1679 = vrcp.f32 %v769_v43  ;;  %v877_v4 = vand.u32 2147483647, %v769_v43  ;;  %vm859_vm14 = vweird.f32 %v766_v42 }
 0x4f5   :  { %v866_v6 = vor.u32 1.1754944e-38, %v865_v60  ;;  %vm873_vm2 = vweird.f32 %v769_v43  ;;  %vm864_vm3 = vcmp.eq.f32.partialorder %v863_v63, 8.507059e+37  ;;  %v880_v10 = vor.u32 1.1754944e-38, %v879_v1 }
 0x4f6   :  { %v843_v46 = vmul.f32 %v1676_v29, %v842_v44  ;;  %vm878_vm5 = vcmp.eq.f32.partialorder %v877_v4, 8.507059e+37 }
 0x4f8   :  { %v844_v48 = vadd.f32 %v1676_v29, %v843_v46 }
 0x4f9   :  { %v1678_v49 = vpop.eup %1677 }
 0x4fa   :  { %v1680_v51 = vpop.eup %1679  ;;  %v848_v53 = vsel %vm847_vm10, %v1676_v29, %v844_v48  ;;  %v855_v55 = vmul.f32 %v1678_v49, %v766_v42  ;;  %v1189_v56 = vpop.permute.xlu2 %1188  ;;  %vm860_vm12 = vweird.f32 %v1678_v49  ;;  %v1727_v29 = vmov 32.0  }
 0x4fb   :  { %v853_v57 = vsel %vm850_vm11, %v852_v50, %v848_v53  ;;  %v869_v12 = vmul.f32 %v1680_v51, %v769_v43  ;;  %1616 = vmatpush.xpose.msk.msra.mxu3 %vm254_vm1, %v1189_v56  ;;  %vm874_vm13 = vweird.f32 %v1680_v51  ;;  %vm861_vm15 = vmor %vm859_vm14, %vm860_vm12  ;;  %1681 = vrcp.f32 %v1727_v29  ;;  %v1472_v29 = vld [vmem:[%s2159_s6 + $0x40] sm:$0xff] }
 0x4fc   :  { %v856_v58 = vsub.f32 1.0, %v855_v55  ;;  %v887_v59 = vmul.f32 %v1990_v14, %v853_v57  ;;  %vm875_vm4 = vmor %vm873_vm2, %vm874_vm13  ;;  %v1355_v57 = vld [vmem:[%s2158_s5 + $0x18] sm:$0xff] }
 0x4fd   :  { %v870_v61 = vsub.f32 1.0, %v869_v12  ;;  %v1354_v12 = vld [vmem:[%s2158_s5 + $0x10] sm:$0xff] }
 0x4fe   :  { %v857_v62 = vmul.f32 %v1678_v49, %v856_v58  ;;  %1613 = vmatmul.msk.f32.vlgmr.msrb.gmra.mxu3 %vm254_vm1, %v887_v59  ;;  %v1353_v58 = vld [vmem:[%s2158_s5 + $0x8] sm:$0xff]  ;;  %v1352_v59 = vld [vmem:[%s2158_s5] sm:$0xff] }
 0x4ff   :  { %v871_v2 = vmul.f32 %v1680_v51, %v870_v61  ;;  %1284 = vmatpush.msrb.mxu3 %v34_v22 }
 0x500   :  { %v858_v5 = vadd.f32 %v1678_v49, %v857_v62 }
 0x501   :  { %v872_v7 = vadd.f32 %v1680_v51, %v871_v2  ;;  %v1682_v41 = vpop.eup %1681 }
 0x502   :  { %v862_v9 = vsel %vm861_vm15, %v1678_v49, %v858_v5  ;;  %v1302_v42 = vmul.f32 32.0, %v1682_v41 }
 0x503   :  { %v867_v11 = vsel %vm864_vm3, %v866_v6, %v862_v9  ;;  %v876_v13 = vsel %vm875_vm4, %v1680_v51, %v872_v7  ;;  %v1346_v7 = vperm.slane %v2036_v20, 3 }
 0x504   :  { %v881_v14 = vsel %vm878_vm5, %v880_v10, %v876_v13  ;;  %v888_v16 = vmul.f32 %v1996_v19, %v867_v11  ;;  %v1349_v11 = vperm.slane %v2036_v20, 4 }
 0x505   :  { %v1240_v17 = vpop.permute.xlu0 %1239  ;;  %v889_v8 = vmul.f32 %v1994_v18, %v881_v14 }
 0x506   :  { %1617 = vmatmul.msk.f32.vlgmr.msra.gmra.mxu3 %vm254_vm1, %v888_v16  ;;  %1619 = vmatpush.xpose.msk.msrb.mxu2 %vm254_vm1, %v1240_v17 }
 0x509   :  { %1620 = vmatmul.msk.f32.vlgmr.msrb.gmra.mxu2 %vm254_vm1, %v889_v8 }
 0x523   :  { %v1185_v18 = vpop.f32.mrf.mxu2 }
 0x53f   :  { %v985_v23 = vpop.f32.mrf.mxu3 }
 0x540   :  { %v986_v28 = vadd.f32 %v985_v23, %v2004_v25 }
 0x542   :  { %v1037_v52 = vadd.f32 %v2007_v26, %v986_v28 }
 0x562   :  { %v1061_v24 = vpop.f32.mrf.mxu3 }
 0x563   :  { %1609 = vmatmul.msk.f32.vlgmr.msra.gmra.mxu1 %vm254_vm1, %v1061_v24 }
 0x564   :  { %1233 = vmatpush.msra.mxu1 %v1951_v21  ;;  %v1290_v21 = vperm.slane %v2036_v20, 0 }
 0x581   :  { %v1139_v19 = vpop.f32.mrf.mxu3 }
 0x582   :  { %1614 = vmatmul.msk.f32.vlgmr.msrb.gmra.mxu1 %vm254_vm1, %v1139_v19 }
 0x583   :  { %1375 = vmatpush.msrb.mxu1 %v1355_v57  ;;  %v1464_v57 = vld [vmem:[%s2159_s6] sm:$0xff] }
 0x585   :  { %1376 = vmatpush.msrb.mxu1 %v1354_v12 }
 0x587   :  { %1377 = vmatpush.msrb.mxu1 %v1353_v58 }
 0x589   :  { %v1212_v54 = vpop.f32.mrf.mxu3  ;;  %1378 = vmatpush.msrb.mxu1 %v1352_v59 }
 0x58a   :  { %1618 = vmatmul.msk.f32.vlgmr.msra.gmra.mxu1 %vm254_vm1, %v1212_v54 }
 0x58c   :  { %v1263_v27 = vpop.f32.mrf.mxu2 }
 0x58d   :  { %1621 = vmatmul.msk.f32.vlgmr.msrb.gmra.mxu3 %vm254_vm1, %v1263_v27  ;;  %vm1306_vm1 = vweird.f32 %v1682_v41 }
 0x5e0   :  { %v1084_v30 = vpop.f32.mrf.mxu1 }
 0x5e1   :  { %v1087_v31 = vadd.f32 %v1084_v30, %v1037_v52  ;;  %v1479_v30 = vld [vmem:[%s2159_s6 + $0x78] sm:$0xff] }
 0x5e2   :  { %1481 = vmatpush.msra.mxu2 %v1479_v30 }
 0x5e3   :  { %v1291_v32 = vadd.f32 %v1290_v21, %v1087_v31  ;;  %v1356_v31 = vperm.slane %v2036_v20, 1 }
 0x5e5   :  { %v1293_v33 = vadd.f32 %v1291_v32, %v1790_v3  ;;  %v1303_v3 = vsub.f32 1.0, %v1302_v42  ;;  %v1478_v32 = vld [vmem:[%s2159_s6 + $0x70] sm:$0xff] }
 0x5e6   :  { %1482 = vmatpush.msra.mxu2 %v1478_v32  ;;  %v1470_v42 = vld [vmem:[%s2159_s6 + $0x30] sm:$0xff] }
 0x5e7   :  { %v1295_v34 = vsel %vm121_vm0, %v1293_v33, 0.0  ;;  %v1304_v43 = vmul.f32 %v1682_v41, %v1303_v3  ;;  %v1469_v3 = vld [vmem:[%s2159_s6 + $0x28] sm:$0xff] }
 0x5e8   :  { %1296 = vadd.xlane.f32.xlu1 %v1295_v34 }
 0x5e9   :  { %v1305_v44 = vadd.f32 %v1682_v41, %v1304_v43 }
 0x5eb   :  { %v2044_v45 = vsel %vm1306_vm1, %v1682_v41, %v1305_v44  ;;  %v1471_v41 = vld [vmem:[%s2159_s6 + $0x38] sm:$0xff]  ;;  %v1468_v44 = vld [vmem:[%s2159_s6 + $0x20] sm:$0xff] }
 0x5ff   :  { %v1162_v35 = vpop.f32.mrf.mxu1 }
 0x600   :  { %v1186_v25 = vadd.f32 %v1185_v18, %v1162_v35 }
 0x607   :  { %v1235_v36 = vpop.f32.mrf.mxu1 }
 0x608   :  { %v1238_v15 = vadd.f32 %v1235_v36, %v1186_v25  ;;  %v1476_v36 = vld [vmem:[%s2159_s6 + $0x60] sm:$0xff] }
 0x610   :  { %v1286_v37 = vpop.f32.mrf.mxu3 }
 0x611   :  { %v1289_v38 = vadd.f32 %v1286_v37, %v1238_v15  ;;  %v1475_v15 = vld [vmem:[%s2159_s6 + $0x58] sm:$0xff] }
 0x613   :  { %v1292_v39 = vadd.f32 %v1290_v21, %v1289_v38  ;;  %v1474_v38 = vld [vmem:[%s2159_s6 + $0x50] sm:$0xff] }
 0x615   :  { %v1294_v40 = vadd.f32 %v1292_v39, %v1780_v0 }
 0x617   :  { %v1298_v26 = vsel %vm121_vm0, %v1294_v40, 0.0 }
 0x618   :  { %1299 = vadd.xlane.f32.xlu0 %v1298_v26 }
 0x65b   :  { %v1297_v46 = vpop.xlane.xlu1 %1296 }
 0x65c   :  { %v1308_v47 = vmul.f32 %v2044_v45, %v1297_v46 }
 0x65e   :  { %v1310_v48 = vsub.f32 %v1293_v33, %v1308_v47  ;;  %v1477_v33 = vld [vmem:[%s2159_s6 + $0x68] sm:$0xff]  ;;  %v1467_v47 = vld [vmem:[%s2159_s6 + $0x18] sm:$0xff] }
 0x65f   :  { %1483 = vmatpush.msra.mxu2 %v1477_v33 }
 0x660   :  { %v1312_v49 = vmul.f32 %v1310_v48, %v1310_v48 }
 0x661   :  { %1484 = vmatpush.msra.mxu2 %v1476_v36 }
 0x662   :  { %v1314_v0 = vsel %vm121_vm0, %v1312_v49, 0.0 }
 0x663   :  { %1315 = vadd.xlane.f32.xlu2 %v1314_v0  ;;  %1485 = vmatpush.msra.mxu2 %v1475_v15  ;;  %v1466_v0 = vld [vmem:[%s2159_s6 + $0x10] sm:$0xff] }
 0x665   :  { %1486 = vmatpush.msra.mxu2 %v1474_v38 }
 0x68b   :  { %v1300_v50 = vpop.xlane.xlu0 %1299 }
 0x68c   :  { %v1309_v51 = vmul.f32 %v2044_v45, %v1300_v50 }
 0x68e   :  { %v1311_v53 = vsub.f32 %v1294_v40, %v1309_v51  ;;  %v1473_v40 = vld [vmem:[%s2159_s6 + $0x48] sm:$0xff] }
 0x68f   :  { %1487 = vmatpush.msra.mxu2 %v1473_v40 }
 0x690   :  { %v1313_v55 = vmul.f32 %v1311_v53, %v1311_v53 }
 0x691   :  { %1488 = vmatpush.msra.mxu2 %v1472_v29 }
 0x692   :  { %v1317_v56 = vsel %vm121_vm0, %v1313_v55, 0.0 }
 0x693   :  { %1318 = vadd.xlane.f32.xlu1 %v1317_v56  ;;  %1489 = vmatpush.msra.mxu2 %v1471_v41 }
 0x695   :  { %1490 = vmatpush.msra.mxu2 %v1470_v42 }
 0x697   :  { %1491 = vmatpush.msra.mxu2 %v1469_v3 }
 0x699   :  { %1492 = vmatpush.msra.mxu2 %v1468_v44 }
 0x69b   :  { %1493 = vmatpush.msra.mxu2 %v1467_v47 }
 0x69d   :  { %1494 = vmatpush.msra.mxu2 %v1466_v0 }
 0x6d6   :  { %v1316_v60 = vpop.xlane.xlu2 %1315 }
 0x6d7   :  { %v1320_v61 = vmul.f32 %v1316_v60, %v2044_v45 }
 0x6d9   :  { %v1322_v62 = vadd.f32 1e-12, %v1320_v61 }
 0x6db   :  { %1683 = vrsqrt.f32 %v1322_v62  ;;  %vm1330_vm7 = vweird.f32 %v1322_v62 }
 0x6e1   :  { %v1684_v63 = vpop.eup %1683 }
 0x6e2   :  { %v1325_v1 = vmul.f32 %v1684_v63, %v1322_v62  ;;  %vm1331_vm6 = vweird.f32 %v1684_v63 }
 0x6e3   :  { %vm1332_vm8 = vmor %vm1330_vm7, %vm1331_vm6 }
 0x6e4   :  { %v1326_v2 = vmul.f32 %v1684_v63, %v1325_v1 }
 0x6e6   :  { %v1327_v4 = vmul.f32 0.5, %v1326_v2 }
 0x6e8   :  { %v1328_v5 = vsub.f32 1.5, %v1327_v4 }
 0x6ea   :  { %v1329_v6 = vmul.f32 %v1684_v63, %v1328_v5 }
 0x6ec   :  { %v1333_v9 = vsel %vm1332_vm8, %v1684_v63, %v1329_v6 }
 0x6ed   :  { %v1344_v10 = vmul.f32 %v1333_v9, %v1310_v48 }
 0x6ef   :  { %v1347_v13 = vmul.f32 %v1346_v7, %v1344_v10 }
 0x6f1   :  { %v2065_v14 = vadd.f32 %v1349_v11, %v1347_v13 }
 0x6f3   :  { %1622 = vmatmul.msk.f32.vlgmr.msrb.gmra.mxu1 %vm121_vm0, %v2065_v14 }
 0x706   :  { %v1319_v16 = vpop.xlane.xlu1 %1318 }
 0x707   :  { %v1321_v17 = vmul.f32 %v1319_v16, %v2044_v45 }
 0x709   :  { %v1323_v8 = vadd.f32 1e-12, %v1321_v17  ;;  %v1728_v17 = vmov -1.0  }
 0x70b   :  { %1685 = vrsqrt.f32 %v1323_v8  ;;  %vm1340_vm10 = vweird.f32 %v1323_v8 }
 0x711   :  { %v1686_v22 = vpop.eup %1685 }
 0x712   :  { %v1335_v23 = vmul.f32 %v1686_v22, %v1323_v8  ;;  %vm1341_vm9 = vweird.f32 %v1686_v22 }
 0x713   :  { %vm1342_vm11 = vmor %vm1340_vm10, %vm1341_vm9 }
 0x714   :  { %v1336_v24 = vmul.f32 %v1686_v22, %v1335_v23 }
 0x716   :  { %v1337_v19 = vmul.f32 0.5, %v1336_v24 }
 0x718   :  { %v1338_v18 = vsub.f32 1.5, %v1337_v19 }
 0x71a   :  { %v1339_v54 = vmul.f32 %v1686_v22, %v1338_v18 }
 0x71c   :  { %v1343_v27 = vsel %vm1342_vm11, %v1686_v22, %v1339_v54 }
 0x71d   :  { %v1345_v28 = vmul.f32 %v1343_v27, %v1311_v53  ;;  %v1465_v53 = vld [vmem:[%s2159_s6 + $0x8] sm:$0xff]  ;;  %s1729_s6 = smov [#allocation2]  }
 0x71e   :  { %1495 = vmatpush.msra.mxu2 %v1465_v53  ;;  %s1562_s29 = sshll.u32 %s1729_s6, 4  ;;  %s1563_s29 = int_to_ptr.vmem [resolvable:$true] %s1562_s29 }
 0x71f   :  { %v1348_v52 = vmul.f32 %v1346_v7, %v1345_v28 }
 0x720   :  { %1496 = vmatpush.msra.mxu2 %v1464_v57  ;;  %v1480_v57 = vperm.slane %v2036_v20, 2 }
 0x721   :  { %v2070_v21 = vadd.f32 %v1349_v11, %v1348_v52 }
 0x723   :  { %1623 = vmatmul.msk.f32.gmra.mxu1 %vm121_vm0, %v2070_v21 }
 0x770   :  { %v1380_v34 = vpop.f32.mrf.mxu1 }
 0x771   :  { %v2086_v35 = vadd.f32 %v1380_v34, %v1356_v31 }
 0x773   :  { %v2092_v25 = vmul.f32 0.70710677, %v2086_v35  ;;  %v1386_v19 = vmul.f32 0.5, %v2086_v35 }
 0x775   :  { %v1394_v37 = vand.u32 2147483647, %v2092_v25  ;;  %vm1390_vm2 = vcmp.ge.f32.partialorder %v2092_v25, 0.0 }
 0x776   :  { %v1392_v8 = vsel %vm1390_vm2, 1.0, %v1728_v17 }
 0x777   :  { %v1396_v39 = vmul.f32 0.3275911, %v1394_v37  ;;  %v1446_v59 = vsub.f32 0.0, %v1394_v37 }
 0x779   :  { %v1398_v26 = vadd.f32 1.0, %v1396_v39  ;;  %v1448_v62 = vmul.f32 %v1446_v59, %v1394_v37 }
 0x77b   :  { %1687 = vrcp.f32 %v1398_v26  ;;  %v1411_v49 = vand.u32 2147483648, %v1398_v26  ;;  %v1409_v51 = vand.u32 2147483647, %v1398_v26  ;;  %vm1405_vm13 = vweird.f32 %v1398_v26 }
 0x77c   :  { %v1450_v2 = vmul.f32 1.442695, %v1448_v62 }
 0x77d   :  { %v1412_v56 = vor.u32 1.1754944e-38, %v1411_v49  ;;  %vm1410_vm15 = vcmp.eq.f32.partialorder %v1409_v51, 8.507059e+37 }
 0x77e   :  { %1689 = vpow2.f32 %v1450_v2 }
 0x781   :  { %v1688_v43 = vpop.eup %1687 }
 0x782   :  { %v1401_v46 = vmul.f32 %v1688_v43, %v1398_v26  ;;  %vm1406_vm12 = vweird.f32 %v1688_v43 }
 0x783   :  { %vm1407_vm14 = vmor %vm1405_vm13, %vm1406_vm12 }
 0x784   :  { %v1402_v48 = vsub.f32 1.0, %v1401_v46  ;;  %v1690_v10 = vpop.eup %1689 }
 0x786   :  { %v1403_v50 = vmul.f32 %v1688_v43, %v1402_v48 }
 0x788   :  { %v1404_v55 = vadd.f32 %v1688_v43, %v1403_v50 }
 0x78a   :  { %v1408_v12 = vsel %vm1407_vm14, %v1688_v43, %v1404_v55 }
 0x78b   :  { %v1413_v58 = vsel %vm1410_vm15, %v1412_v56, %v1408_v12 }
 0x78c   :  { %v1428_v60 = vmul.f32 1.0614054, %v1413_v58 }
 0x78e   :  { %v1430_v61 = vadd.f32 -1.4531521, %v1428_v60 }
 0x790   :  { %v1432_v63 = vmul.f32 %v1430_v61, %v1413_v58 }
 0x792   :  { %v1434_v1 = vadd.f32 1.4214138, %v1432_v63 }
 0x794   :  { %v1436_v4 = vmul.f32 %v1434_v1, %v1413_v58 }
 0x796   :  { %v1438_v5 = vadd.f32 -0.28449672, %v1436_v4 }
 0x798   :  { %v1440_v6 = vmul.f32 %v1438_v5, %v1413_v58 }
 0x79a   :  { %v1442_v7 = vadd.f32 0.2548296, %v1440_v6 }
 0x79c   :  { %v1444_v9 = vmul.f32 %v1442_v7, %v1413_v58 }
 0x79e   :  { %v1454_v11 = vmul.f32 %v1690_v10, %v1444_v9 }
 0x7a0   :  { %v1456_v13 = vsub.f32 1.0, %v1454_v11  ;;  %v1383_v16 = vpop.f32.mrf.mxu1 }
 0x7a1   :  { %v1384_v22 = vadd.f32 %v1383_v16, %v1356_v31 }
 0x7a2   :  { %v1458_v23 = vmul.f32 %v1456_v13, %v1392_v8 }
 0x7a3   :  { %v1389_v24 = vmul.f32 0.70710677, %v1384_v22  ;;  %v1387_v53 = vmul.f32 0.5, %v1384_v22 }
 0x7a4   :  { %v1460_v18 = vadd.f32 1.0, %v1458_v23 }
 0x7a5   :  { %v1395_v54 = vand.u32 2147483647, %v1389_v24  ;;  %vm1391_vm6 = vcmp.ge.f32.partialorder %v1389_v24, 0.0 }
 0x7a6   :  { %v1462_v27 = vmul.f32 %v1460_v18, %v1386_v19  ;;  %v1393_v50 = vsel %vm1391_vm6, 1.0, %v1728_v17 }
 0x7a7   :  { %v1397_v28 = vmul.f32 0.3275911, %v1395_v54  ;;  %v1447_v35 = vsub.f32 0.0, %v1395_v54 }
 0x7a8   :  { %1497 = vmatmul.f32.vlgmr.msra.gmra.mxu2 %v1462_v27 }
 0x7a9   :  { %v1399_v52 = vadd.f32 1.0, %v1397_v28  ;;  %v1449_v26 = vmul.f32 %v1447_v35, %v1395_v54  ;;  %v1550_v54 = vperm.slane %v2036_v20, 5 }
 0x7ab   :  { %1691 = vrcp.f32 %v1399_v52  ;;  %v1425_v34 = vand.u32 2147483648, %v1399_v52  ;;  %v1423_v25 = vand.u32 2147483647, %v1399_v52  ;;  %vm1419_vm4 = vweird.f32 %v1399_v52 }
 0x7ac   :  { %v1452_v42 = vmul.f32 1.442695, %v1449_v26 }
 0x7ad   :  { %v1426_v31 = vor.u32 1.1754944e-38, %v1425_v34  ;;  %vm1424_vm1 = vcmp.eq.f32.partialorder %v1423_v25, 8.507059e+37 }
 0x7ae   :  { %1693 = vpow2.f32 %v1452_v42 }
 0x7b1   :  { %v1692_v30 = vpop.eup %1691 }
 0x7b2   :  { %v1415_v32 = vmul.f32 %v1692_v30, %v1399_v52  ;;  %vm1420_vm3 = vweird.f32 %v1692_v30  ;;  %v1553_v52 = vperm.slane %v2036_v20, 6 }
 0x7b3   :  { %vm1421_vm5 = vmor %vm1419_vm4, %vm1420_vm3 }
 0x7b4   :  { %v1416_v33 = vsub.f32 1.0, %v1415_v32  ;;  %v1694_v48 = vpop.eup %1693 }
 0x7b6   :  { %v1417_v36 = vmul.f32 %v1692_v30, %v1416_v33 }
 0x7b8   :  { %v1418_v15 = vadd.f32 %v1692_v30, %v1417_v36 }
 0x7ba   :  { %v1422_v37 = vsel %vm1421_vm5, %v1692_v30, %v1418_v15 }
 0x7bb   :  { %v1427_v38 = vsel %vm1424_vm1, %v1426_v31, %v1422_v37 }
 0x7bc   :  { %v1429_v39 = vmul.f32 1.0614054, %v1427_v38 }
 0x7be   :  { %v1431_v40 = vadd.f32 -1.4531521, %v1429_v39 }
 0x7c0   :  { %v1433_v29 = vmul.f32 %v1431_v40, %v1427_v38 }
 0x7c2   :  { %v1435_v41 = vadd.f32 1.4214138, %v1433_v29 }
 0x7c4   :  { %v1437_v3 = vmul.f32 %v1435_v41, %v1427_v38 }
 0x7c6   :  { %v1439_v43 = vadd.f32 -0.28449672, %v1437_v3 }
 0x7c8   :  { %v1441_v44 = vmul.f32 %v1439_v43, %v1427_v38 }
 0x7ca   :  { %v1443_v46 = vadd.f32 0.2548296, %v1441_v44 }
 0x7cc   :  { %v1445_v47 = vmul.f32 %v1443_v46, %v1427_v38 }
 0x7ce   :  { %v1455_v49 = vmul.f32 %v1694_v48, %v1445_v47 }
 0x7d0   :  { %v1457_v0 = vsub.f32 1.0, %v1455_v49 }
 0x7d2   :  { %v1459_v51 = vmul.f32 %v1457_v0, %v1393_v50 }
 0x7d4   :  { %v1461_v55 = vadd.f32 1.0, %v1459_v51 }
 0x7d6   :  { %v1463_v56 = vmul.f32 %v1461_v55, %v1387_v53 }
 0x7d8   :  { %1500 = vmatmul.f32.gmra.mxu2 %v1463_v56 }
 0x82b   :  { %v1498_v12 = vpop.f32.mrf.mxu2 }
 0x82c   :  { %v1499_v58 = vadd.f32 %v1498_v12, %v1480_v57 }
 0x82e   :  { %v1504_v59 = vadd.f32 %v1499_v58, %v2065_v14 }
 0x830   :  { %v1506_v60 = vsel %vm121_vm0, %v1504_v59, 0.0 }
 0x831   :  { %1507 = vadd.xlane.f32.xlu1 %v1506_v60 }
 0x85b   :  { %v1501_v61 = vpop.f32.mrf.mxu2 }
 0x85c   :  { %v1502_v62 = vadd.f32 %v1501_v61, %v1480_v57 }
 0x85e   :  { %v1505_v63 = vadd.f32 %v1502_v62, %v2070_v21 }
 0x860   :  { %v1509_v1 = vsel %vm121_vm0, %v1505_v63, 0.0 }
 0x861   :  { %1510 = vadd.xlane.f32.xlu0 %v1509_v1 }
 0x8a4   :  { %v1508_v2 = vpop.xlane.xlu1 %1507 }
 0x8a5   :  { %v1512_v4 = vmul.f32 %v1508_v2, %v2044_v45 }
 0x8a7   :  { %v1514_v5 = vsub.f32 %v1504_v59, %v1512_v4 }
 0x8a9   :  { %v1516_v6 = vmul.f32 %v1514_v5, %v1514_v5 }
 0x8ab   :  { %v1518_v7 = vsel %vm121_vm0, %v1516_v6, 0.0 }
 0x8ac   :  { %1519 = vadd.xlane.f32.xlu1 %v1518_v7 }
 0x8d4   :  { %v1511_v9 = vpop.xlane.xlu0 %1510 }
 0x8d5   :  { %v1513_v14 = vmul.f32 %v1511_v9, %v2044_v45 }
 0x8d7   :  { %v1515_v10 = vsub.f32 %v1505_v63, %v1513_v14 }
 0x8d9   :  { %v1517_v11 = vmul.f32 %v1515_v10, %v1515_v10 }
 0x8db   :  { %v1521_v13 = vsel %vm121_vm0, %v1517_v11, 0.0 }
 0x8dc   :  { %1522 = vadd.xlane.f32.xlu2 %v1521_v13 }
 0x91f   :  { %v1520_v21 = vpop.xlane.xlu1 %1519 }
 0x920   :  { %v1524_v16 = vmul.f32 %v1520_v21, %v2044_v45 }
 0x922   :  { %v1526_v17 = vadd.f32 1e-12, %v1524_v16 }
 0x924   :  { %1695 = vrsqrt.f32 %v1526_v17  ;;  %vm1534_vm8 = vweird.f32 %v1526_v17 }
 0x92a   :  { %v1696_v8 = vpop.eup %1695 }
 0x92b   :  { %v1529_v22 = vmul.f32 %v1696_v8, %v1526_v17  ;;  %vm1535_vm7 = vweird.f32 %v1696_v8 }
 0x92c   :  { %vm1536_vm9 = vmor %vm1534_vm8, %vm1535_vm7 }
 0x92d   :  { %v1530_v23 = vmul.f32 %v1696_v8, %v1529_v22 }
 0x92f   :  { %v1531_v24 = vmul.f32 0.5, %v1530_v23 }
 0x931   :  { %v1532_v19 = vsub.f32 1.5, %v1531_v24 }
 0x933   :  { %v1533_v18 = vmul.f32 %v1696_v8, %v1532_v19 }
 0x935   :  { %v1537_v27 = vsel %vm1536_vm9, %v1696_v8, %v1533_v18 }
 0x936   :  { %v1548_v28 = vmul.f32 %v1537_v27, %v1514_v5 }
 0x938   :  { %v1551_v30 = vmul.f32 %v1550_v54, %v1548_v28 }
 0x93a   :  { %v1554_v32 = vadd.f32 %v1553_v52, %v1551_v30 }
 0x93c   :  { %1556 = vst.msk [vmem:[#allocation2] sm:$0xff] %vm121_vm0, %v1554_v32 }
 0x94f   :  { %v1523_v33 = vpop.xlane.xlu2 %1522 }
 0x950   :  { %v1525_v34 = vmul.f32 %v1523_v33, %v2044_v45 }
 0x952   :  { %v1527_v36 = vadd.f32 1e-12, %v1525_v34 }
 0x954   :  { %1697 = vrsqrt.f32 %v1527_v36  ;;  %vm1544_vm11 = vweird.f32 %v1527_v36 }
 0x95a   :  { %v1698_v25 = vpop.eup %1697 }
 0x95b   :  { %v1539_v15 = vmul.f32 %v1698_v25, %v1527_v36  ;;  %vm1545_vm10 = vweird.f32 %v1698_v25 }
 0x95c   :  { %vm1546_vm12 = vmor %vm1544_vm11, %vm1545_vm10 }
 0x95d   :  { %v1540_v31 = vmul.f32 %v1698_v25, %v1539_v15 }
 0x95f   :  { %v1541_v37 = vmul.f32 0.5, %v1540_v31 }
 0x961   :  { %v1542_v35 = vsub.f32 1.5, %v1541_v37 }
 0x963   :  { %v1543_v38 = vmul.f32 %v1698_v25, %v1542_v35 }
 0x965   :  { %v1547_v39 = vsel %vm1546_vm12, %v1698_v25, %v1543_v38 }
 0x966   :  { %v1549_v20 = vmul.f32 %v1547_v39, %v1515_v10 }
 0x968   :  { %v1552_v45 = vmul.f32 %v1550_v54, %v1549_v20 }
 0x96a   :  { %v1555_v40 = vadd.f32 %v1553_v52, %v1552_v45 }
 0x96c   :  { %1557 = vst.msk [vmem:[#allocation2 + $0x8] sm:$0xff] %vm121_vm0, %v1555_v40 }
 0x96d   :  { %1570 = dma.vmem_to_hbm [thread:$0]  %s1563_s29, 256, %s1565_s11, [#allocation3], %s1730_s12, %s1730_s12, %s1731_s13  }
 0x96e   :  { %1723 = dma.done.wait [#allocation3], 256  }
 0x96f   :  { %1724 = vsyncadd [#allocation3], 4294967040 }
 0x970   :  { %1575 = vsyncpa [#allocation3], 1 }

</bundles_post_ra>
